<compile_context>
chip_gen: v5e
topology: v5e:2x2
jax: 0.10.0
libtpu: 0.0.40
codegen_flags: <defaults>
</compile_context>

<pallas_src>
import math

import numpy as np

import jax
import jax.numpy as jnp
from jax.experimental import pallas as pl
from jax.experimental.pallas import tpu as pltpu

NEG_INF = -1e30  # stands in for float('-inf') in the attention mask


# ---------------------------------------------------------------- helpers ----
def _ln(x, g, b, eps=1e-5):
    mu = jnp.mean(x, axis=-1, keepdims=True)
    var = jnp.mean((x - mu) ** 2, axis=-1, keepdims=True)
    return (x - mu) * jax.lax.rsqrt(var + eps) * g + b


# ------------------------------------------------- fused stage kernel --------
def _make_stage_kernel(n, dim, heads, head_dim, disp, shifted_flags, use_norm):
    """Per-batch program: patch-merge matmul -> (opt LN) -> [LN -> W-MSA -> +res -> LN -> MLP -> +res] * L."""
    inv_sqrt2 = 1.0 / math.sqrt(2.0)
    bf16, f32 = jnp.bfloat16, jnp.float32

    def kernel(p_ref, pmw_ref, pmb_ref, ng_ref, nb_ref,
               ln1g_ref, ln1b_ref, wqkv_ref, wo_ref, bo_ref, bias_ref,
               ln2g_ref, ln2b_ref, w1_ref, b1_ref, w2_ref, b2_ref, o_ref):
        # ---- patch merging: Conv1d(kernel=stride=df) == flattened-patch matmul ----
        x = jnp.dot(p_ref[...], pmw_ref[...], preferred_element_type=f32) + pmb_ref[...]
        if use_norm:
            x = _ln(x, ng_ref[...], nb_ref[...])

        for bi, shifted in enumerate(shifted_flags):            # static unroll (L small)
            # ---- attention branch: LN -> (cyclic shift) -> windowed MHSA -> proj ----
            xn = _ln(x, ln1g_ref[bi], ln1b_ref[bi])
            if shifted:
                # torch.roll(x, -disp, dim=seq): out[i] = x[(i + disp) % n]
                # == np.roll(x, n - disp).  XLU sublane rotation; no MXU, no perm matrix.
                xn = pltpu.roll(xn, n - disp, axis=0)
            xb = xn.astype(bf16)                                 # single cast per block

            # fused QKV projection (head_dim**-0.5 already folded into the Q weights)
            qkv = jnp.dot(xb, wqkv_ref[bi], preferred_element_type=f32)   # (n, 3*dim) f32
            bias = bias_ref[bi]                                  # (n, n), hoisted out of head loop

            head_out = []
            for h in range(heads):                               # static unroll over heads
                q = qkv[:, h * head_dim:(h + 1) * head_dim].astype(bf16)
                k = qkv[:, dim + h * head_dim:dim + (h + 1) * head_dim].astype(bf16)
                v = qkv[:, 2 * dim + h * head_dim:2 * dim + (h + 1) * head_dim].astype(bf16)
                # full-sequence scores; window structure + rel-pos bias + shift mask
                # are all folded into `bias` (NEG_INF outside each window block).
                dots = jax.lax.dot_general(
                    q, k, (((1,), (1,)), ((), ())),
                    preferred_element_type=f32) + bias
                m = jnp.max(dots, axis=-1, keepdims=True)
                e = jnp.exp(dots - m)
                attn = e * pl.reciprocal(jnp.sum(e, axis=-1, keepdims=True), approx=True)
                head_out.append(jnp.dot(attn.astype(bf16), v, preferred_element_type=f32))
            # single fused output projection on the lane-concat of the head outputs
            o_cat = jnp.concatenate(head_out, axis=-1).astype(bf16)        # (n, dim)
            proj = jnp.dot(o_cat, wo_ref[bi], preferred_element_type=f32) + bo_ref[bi]
            # NOTE: shifted attention output intentionally NOT rolled back (reference quirk).
            x = x + proj

            # ---- MLP branch: LN -> Linear -> exact GELU -> Linear ----
            yn = _ln(x, ln2g_ref[bi], ln2b_ref[bi])
            h1 = jnp.dot(yn.astype(bf16), w1_ref[bi], preferred_element_type=f32) + b1_ref[bi]
            h1 = 0.5 * h1 * (1.0 + jax.lax.erf(h1 * inv_sqrt2))
            x = x + jnp.dot(h1.astype(bf16), w2_ref[bi], preferred_element_type=f32) + b2_ref[bi]

        o_ref[...] = x.astype(o_ref.dtype)

    return kernel


# ------------------------------------------------------------- parameters ----
def init_params(key, *, seq_len, in_channels, hidden_dimension, layers,
                downscaling_factor, num_heads, head_dim, window_size,
                relative_pos_embedding=True, use_norm=False):
    assert layers % 2 == 0, 'layers must be divisible by 2 (regular + shifted block)'
    assert num_heads * head_dim == hidden_dimension
    assert seq_len % downscaling_factor == 0
    n = seq_len // downscaling_factor
    w = window_size
    assert n % w == 0
    dim = hidden_dimension
    disp = w // 2
    L = layers
    inv_scale = float(head_dim) ** -0.5

    keys = iter(jax.random.split(key, 8 * layers + 8))

    def nrm(shape, std=0.02):
        return np.array(std * jax.random.normal(next(keys), shape, jnp.float32))

    # relative index quirk: pos_embedding[rel_idx, rel_idx] == diag(pe)[rel_idx]
    rel_idx = (np.arange(w)[None, :] - np.arange(w)[:, None]) + (w - 1)        # (w, w)

    # shifted-window mask (added only to the LAST window of the sequence)
    mask = np.zeros((w, w), np.float32)
    mask[-disp:, :-disp] = NEG_INF
    mask[:-disp, -disp:] = NEG_INF

    shifted_flags = tuple(bool(j % 2) for j in range(L))     # (False, True, False, True, ...)

    ln1_g, ln1_b, ln2_g, ln2_b = [], [], [], []
    wqkv_l, wo_l, bo_l, w1_l, b1_l, w2_l, b2_l, bias_l = [], [], [], [], [], [], [], []
    for shifted in shifted_flags:
        ln1_g.append(np.ones((1, dim), np.float32)); ln1_b.append(np.zeros((1, dim), np.float32))
        ln2_g.append(np.ones((1, dim), np.float32)); ln2_b.append(np.zeros((1, dim), np.float32))
        wqkv = nrm((dim, 3 * dim))                              # to_qkv (no bias)
        wqkv[:, :dim] *= inv_scale                              # fold head_dim**-0.5 into Wq
        wqkv_l.append(wqkv)
        wo_l.append(nrm((dim, dim)))                            # to_out weight (inner_dim == dim)
        bo_l.append(np.zeros((1, dim), np.float32))
        w1_l.append(nrm((dim, 4 * dim))); b1_l.append(np.zeros((1, 4 * dim), np.float32))
        w2_l.append(nrm((4 * dim, dim))); b2_l.append(np.zeros((1, dim), np.float32))

        if relative_pos_embedding:
            pe = np.asarray(jax.random.normal(next(keys), (2 * w - 1, 2 * w - 1), jnp.float32))
            rel = np.diag(pe)[rel_idx]                          # faithful double fancy index
        else:
            rel = np.zeros((w, w), np.float32)
        # per-sequence (n, n) additive attention bias: block-diagonal windows carry the
        # rel-pos bias, everything else NEG_INF; shifted blocks add the mask to the LAST window.
        # (kept f32 here; at scale store bf16 to halve the quadratic VMEM term)
        full = np.full((n, n), NEG_INF, np.float32)
        for wi in range(n // w):
            s = wi * w
            full[s:s + w, s:s + w] = rel
        if shifted:
            full[n - w:, n - w:] += mask
        bias_l.append(full)

    bf16 = jnp.bfloat16
    return dict(
        df=downscaling_factor, dim=dim, heads=num_heads, head_dim=head_dim,
        window=w, n=n, disp=disp, use_norm=use_norm, shifted=shifted_flags,
        in_channels=in_channels,
        pm_w=jnp.asarray(nrm((in_channels * downscaling_factor, dim))).astype(bf16),
        pm_b=jnp.zeros((1, dim), jnp.float32),
        norm_g=jnp.ones((1, dim), jnp.float32),
        norm_b=jnp.zeros((1, dim), jnp.float32),
        ln1_g=jnp.asarray(np.stack(ln1_g)), ln1_b=jnp.asarray(np.stack(ln1_b)),
        wqkv=jnp.asarray(np.stack(wqkv_l)).astype(bf16),
        wo=jnp.asarray(np.stack(wo_l)).astype(bf16),
        bo=jnp.asarray(np.stack(bo_l)),
        bias=jnp.asarray(np.stack(bias_l)),
        ln2_g=jnp.asarray(np.stack(ln2_g)), ln2_b=jnp.asarray(np.stack(ln2_b)),
        w1=jnp.asarray(np.stack(w1_l)).astype(bf16), b1=jnp.asarray(np.stack(b1_l)),
        w2=jnp.asarray(np.stack(w2_l)).astype(bf16), b2=jnp.asarray(np.stack(b2_l)),
    )


# ---------------------------------------------------------------- forward ----
def stage_forward(x_bcl, params):
    """StageModule.forward: x (b, c, l) -> (b, hidden, l // df), one pallas_call gridded over batch."""
    B, C, Lseq = x_bcl.shape
    df, dim, n = params['df'], params['dim'], params['n']
    heads, head_dim = params['heads'], params['head_dim']
    assert Lseq // df == n and C == params['in_channels'], \
        'attention bias was baked for a different (seq, channels) at init'
    Cdf = C * df

    # patch flatten (one tiny XLA op): p[b, t, c*df + k] = x[b, c, t*df + k]
    patches = (x_bcl.reshape(B, C, n, df)
               .transpose(0, 2, 1, 3)
               .reshape(B, n, Cdf)).astype(jnp.bfloat16)

    kernel = _make_stage_kernel(n, dim, heads, head_dim, params['disp'],
                                params['shifted'], params['use_norm'])

    def full(a):  # whole-array block, constant index (weights are grid-invariant)
        return pl.BlockSpec(a.shape, lambda b, nd=a.ndim: (0,) * nd)

    out = pl.pallas_call(
        kernel,
        grid=(B,),
        in_specs=[
            pl.BlockSpec((None, n, Cdf), lambda b: (b, 0, 0)),    # per-batch activations
            full(params['pm_w']), full(params['pm_b']),
            full(params['norm_g']), full(params['norm_b']),
            full(params['ln1_g']), full(params['ln1_b']),
            full(params['wqkv']), full(params['wo']), full(params['bo']),
            full(params['bias']),
            full(params['ln2_g']), full(params['ln2_b']),
            full(params['w1']), full(params['b1']),
            full(params['w2']), full(params['b2']),
        ],
        out_specs=pl.BlockSpec((None, n, dim), lambda b: (b, 0, 0)),
        out_shape=jax.ShapeDtypeStruct((B, n, dim), jnp.float32),
        compiler_params=pltpu.CompilerParams(dimension_semantics=("parallel",)),
    )(patches, params['pm_w'], params['pm_b'], params['norm_g'], params['norm_b'],
      params['ln1_g'], params['ln1_b'],
      params['wqkv'], params['wo'], params['bo'], params['bias'],
      params['ln2_g'], params['ln2_b'],
      params['w1'], params['b1'], params['w2'], params['b2'])

    # StageModule returns channels-first: (b, hidden, l')
    # TODO(synk): fold this transpose into the kernel if xprof shows the dispatch matters.
    return out.transpose(0, 2, 1)


# --------------------------------------------------------------------- main --
if __name__ == "__main__":
    cfg = dict(seq_len=32, in_channels=4, hidden_dimension=16, layers=2,
               downscaling_factor=2, num_heads=2, head_dim=8, window_size=4,
               relative_pos_embedding=True, use_norm=False)   # norm_layer=None default
    B = 2
    key = jax.random.PRNGKey(0)
    pkey, xkey = jax.random.split(key)
    params = init_params(pkey, **cfg)

    x = jax.random.normal(xkey, (B, cfg['in_channels'], cfg['seq_len']), jnp.float32)  # (b, c, l)

    fwd = jax.jit(lambda inp: stage_forward(inp, params))
    out = fwd(x)
    jax.block_until_ready(out)

    out_len = cfg['seq_len'] // cfg['downscaling_factor']
    assert out.shape == (B, cfg['hidden_dimension'], out_len), out.shape
    assert bool(jnp.all(jnp.isfinite(out)))
    print("KERNEL_OK")
</pallas_src>

<mosaic_0001>
module attributes {stable_mosaic.version = 11 : i64} {
  func.func @kernel(%arg0: i32, %arg1: memref<1x16x8xbf16, #tpu.memory_space<vmem>>, %arg2: memref<8x16xbf16, #tpu.memory_space<vmem>>, %arg3: memref<1x16xf32, #tpu.memory_space<vmem>>, %arg4: memref<1x16xf32, #tpu.memory_space<vmem>>, %arg5: memref<1x16xf32, #tpu.memory_space<vmem>>, %arg6: memref<2x1x16xf32, #tpu.memory_space<vmem>>, %arg7: memref<2x1x16xf32, #tpu.memory_space<vmem>>, %arg8: memref<2x16x48xbf16, #tpu.memory_space<vmem>>, %arg9: memref<2x16x16xbf16, #tpu.memory_space<vmem>>, %arg10: memref<2x1x16xf32, #tpu.memory_space<vmem>>, %arg11: memref<2x16x16xf32, #tpu.memory_space<vmem>>, %arg12: memref<2x1x16xf32, #tpu.memory_space<vmem>>, %arg13: memref<2x1x16xf32, #tpu.memory_space<vmem>>, %arg14: memref<2x16x64xbf16, #tpu.memory_space<vmem>>, %arg15: memref<2x1x64xf32, #tpu.memory_space<vmem>>, %arg16: memref<2x64x16xbf16, #tpu.memory_space<vmem>>, %arg17: memref<2x1x16xf32, #tpu.memory_space<vmem>>, %arg18: memref<1x16x16xf32, #tpu.memory_space<vmem>>) attributes {dimension_semantics = [#tpu.dimension_semantics<parallel>], iteration_bounds = array<i64: 2>, scalar_prefetch = 0 : i64, scratch_operands = 0 : i64, tpu.core_type = #tpu.core_type<tc>, window_params = [{transform_indices = @transform_0, window_bounds = array<i64: 1, 16, 8>}, {pipeline_mode = #tpu.pipeline_mode<synchronous>, transform_indices = @transform_1, window_bounds = array<i64: 8, 16>}, {pipeline_mode = #tpu.pipeline_mode<synchronous>, transform_indices = @transform_2, window_bounds = array<i64: 1, 16>}, {pipeline_mode = #tpu.pipeline_mode<synchronous>, transform_indices = @transform_3, window_bounds = array<i64: 1, 16>}, {pipeline_mode = #tpu.pipeline_mode<synchronous>, transform_indices = @transform_4, window_bounds = array<i64: 1, 16>}, {pipeline_mode = #tpu.pipeline_mode<synchronous>, transform_indices = @transform_5, window_bounds = array<i64: 2, 1, 16>}, {pipeline_mode = #tpu.pipeline_mode<synchronous>, transform_indices = @transform_6, window_bounds = array<i64: 2, 1, 16>}, {pipeline_mode = #tpu.pipeline_mode<synchronous>, transform_indices = @transform_7, window_bounds = array<i64: 2, 16, 48>}, {pipeline_mode = #tpu.pipeline_mode<synchronous>, transform_indices = @transform_8, window_bounds = array<i64: 2, 16, 16>}, {pipeline_mode = #tpu.pipeline_mode<synchronous>, transform_indices = @transform_9, window_bounds = array<i64: 2, 1, 16>}, {pipeline_mode = #tpu.pipeline_mode<synchronous>, transform_indices = @transform_10, window_bounds = array<i64: 2, 16, 16>}, {pipeline_mode = #tpu.pipeline_mode<synchronous>, transform_indices = @transform_11, window_bounds = array<i64: 2, 1, 16>}, {pipeline_mode = #tpu.pipeline_mode<synchronous>, transform_indices = @transform_12, window_bounds = array<i64: 2, 1, 16>}, {pipeline_mode = #tpu.pipeline_mode<synchronous>, transform_indices = @transform_13, window_bounds = array<i64: 2, 16, 64>}, {pipeline_mode = #tpu.pipeline_mode<synchronous>, transform_indices = @transform_14, window_bounds = array<i64: 2, 1, 64>}, {pipeline_mode = #tpu.pipeline_mode<synchronous>, transform_indices = @transform_15, window_bounds = array<i64: 2, 64, 16>}, {pipeline_mode = #tpu.pipeline_mode<synchronous>, transform_indices = @transform_16, window_bounds = array<i64: 2, 1, 16>}, {transform_indices = @transform_17, window_bounds = array<i64: 1, 16, 16>}]} {
    %c0 = arith.constant 0 : index
    %c0_0 = arith.constant 0 : index
    %c0_1 = arith.constant 0 : index
    %0 = vector.load %arg1[%c0, %c0_0, %c0_1] : memref<1x16x8xbf16, #tpu.memory_space<vmem>>, vector<1x16x8xbf16>
    %1 = vector.shape_cast %0 : vector<1x16x8xbf16> to vector<16x8xbf16>
    %c0_2 = arith.constant 0 : index
    %c0_3 = arith.constant 0 : index
    %2 = vector.load %arg2[%c0_2, %c0_3] : memref<8x16xbf16, #tpu.memory_space<vmem>>, vector<8x16xbf16>
    %cst = arith.constant dense<0.000000e+00> : vector<16x16xf32>
    %3 = tpu.matmul %1, %2, %cst {dimension_numbers = #tpu.dot_dimension_numbers<[1], [0], [0], [1], [0, 0, 1, 1], [], []>} : vector<16x8xbf16>, vector<8x16xbf16>, vector<16x16xf32> -> vector<16x16xf32>
    %c0_4 = arith.constant 0 : index
    %c0_5 = arith.constant 0 : index
    %4 = vector.load %arg3[%c0_4, %c0_5] : memref<1x16xf32, #tpu.memory_space<vmem>>, vector<1x16xf32>
    %5 = vector.broadcast %4 : vector<1x16xf32> to vector<16x16xf32>
    %6 = arith.addf %3, %5 : vector<16x16xf32>
    %c0_6 = arith.constant 0 : index
    %c0_7 = arith.constant 0 : index
    %c0_8 = arith.constant 0 : index
    %7 = vector.load %arg6[%c0_6, %c0_7, %c0_8] : memref<2x1x16xf32, #tpu.memory_space<vmem>>, vector<1x1x16xf32>
    %8 = vector.shape_cast %7 : vector<1x1x16xf32> to vector<1x16xf32>
    %c0_9 = arith.constant 0 : index
    %c0_10 = arith.constant 0 : index
    %c0_11 = arith.constant 0 : index
    %9 = vector.load %arg7[%c0_9, %c0_10, %c0_11] : memref<2x1x16xf32, #tpu.memory_space<vmem>>, vector<1x1x16xf32>
    %10 = vector.shape_cast %9 : vector<1x1x16xf32> to vector<1x16xf32>
    %cst_12 = arith.constant dense<0.000000e+00> : vector<16xf32>
    %11 = vector.multi_reduction <add>, %6, %cst_12 [1] : vector<16x16xf32> to vector<16xf32>
    %12 = vector.shape_cast %11 : vector<16xf32> to vector<16x1xf32>
    %cst_13 = arith.constant 1.600000e+01 : f32
    %13 = vector.broadcast %cst_13 : f32 to vector<16x1xf32>
    %14 = arith.divf %12, %13 : vector<16x1xf32>
    %15 = vector.broadcast %14 : vector<16x1xf32> to vector<16x16xf32>
    %16 = arith.subf %6, %15 : vector<16x16xf32>
    %17 = arith.mulf %16, %16 : vector<16x16xf32>
    %cst_14 = arith.constant dense<0.000000e+00> : vector<16xf32>
    %18 = vector.multi_reduction <add>, %17, %cst_14 [1] : vector<16x16xf32> to vector<16xf32>
    %19 = vector.shape_cast %18 : vector<16xf32> to vector<16x1xf32>
    %cst_15 = arith.constant 1.600000e+01 : f32
    %20 = vector.broadcast %cst_15 : f32 to vector<16x1xf32>
    %21 = arith.divf %19, %20 : vector<16x1xf32>
    %22 = vector.broadcast %14 : vector<16x1xf32> to vector<16x16xf32>
    %23 = arith.subf %6, %22 : vector<16x16xf32>
    %cst_16 = arith.constant 9.99999974E-6 : f32
    %24 = vector.broadcast %cst_16 : f32 to vector<16x1xf32>
    %25 = arith.addf %21, %24 : vector<16x1xf32>
    %26 = math.rsqrt %25 : vector<16x1xf32>
    %27 = vector.broadcast %26 : vector<16x1xf32> to vector<16x16xf32>
    %28 = arith.mulf %23, %27 : vector<16x16xf32>
    %29 = vector.broadcast %8 : vector<1x16xf32> to vector<16x16xf32>
    %30 = arith.mulf %28, %29 : vector<16x16xf32>
    %31 = vector.broadcast %10 : vector<1x16xf32> to vector<16x16xf32>
    %32 = arith.addf %30, %31 : vector<16x16xf32>
    %33 = arith.truncf %32 : vector<16x16xf32> to vector<16x16xbf16>
    %c0_17 = arith.constant 0 : index
    %c0_18 = arith.constant 0 : index
    %c0_19 = arith.constant 0 : index
    %34 = vector.load %arg8[%c0_17, %c0_18, %c0_19] : memref<2x16x48xbf16, #tpu.memory_space<vmem>>, vector<1x16x48xbf16>
    %35 = vector.shape_cast %34 : vector<1x16x48xbf16> to vector<16x48xbf16>
    %cst_20 = arith.constant dense<0.000000e+00> : vector<16x48xf32>
    %36 = tpu.matmul %33, %35, %cst_20 {dimension_numbers = #tpu.dot_dimension_numbers<[1], [0], [0], [1], [0, 0, 1, 1], [], []>} : vector<16x16xbf16>, vector<16x48xbf16>, vector<16x48xf32> -> vector<16x48xf32>
    %c0_21 = arith.constant 0 : index
    %c0_22 = arith.constant 0 : index
    %c0_23 = arith.constant 0 : index
    %37 = vector.load %arg11[%c0_21, %c0_22, %c0_23] : memref<2x16x16xf32, #tpu.memory_space<vmem>>, vector<1x16x16xf32>
    %38 = vector.shape_cast %37 : vector<1x16x16xf32> to vector<16x16xf32>
    %39 = vector.extract_strided_slice %36 {offsets = [0, 0], sizes = [16, 8], strides = [1, 1]} : vector<16x48xf32> to vector<16x8xf32>
    %40 = arith.truncf %39 : vector<16x8xf32> to vector<16x8xbf16>
    %41 = vector.extract_strided_slice %36 {offsets = [0, 16], sizes = [16, 8], strides = [1, 1]} : vector<16x48xf32> to vector<16x8xf32>
    %42 = arith.truncf %41 : vector<16x8xf32> to vector<16x8xbf16>
    %43 = vector.extract_strided_slice %36 {offsets = [0, 32], sizes = [16, 8], strides = [1, 1]} : vector<16x48xf32> to vector<16x8xf32>
    %44 = arith.truncf %43 : vector<16x8xf32> to vector<16x8xbf16>
    %cst_24 = arith.constant dense<0.000000e+00> : vector<16x16xf32>
    %45 = tpu.matmul %40, %42, %cst_24 {dimension_numbers = #tpu.dot_dimension_numbers<[1], [1], [0], [0], [0, 0, 1, 0], [], []>} : vector<16x8xbf16>, vector<16x8xbf16>, vector<16x16xf32> -> vector<16x16xf32>
    %46 = arith.addf %45, %38 : vector<16x16xf32>
    %cst_25 = arith.constant dense<0xFF800000> : vector<16xf32>
    %47 = vector.multi_reduction <maximumf>, %46, %cst_25 [1] : vector<16x16xf32> to vector<16xf32>
    %48 = vector.shape_cast %47 : vector<16xf32> to vector<16x1xf32>
    %49 = vector.broadcast %48 : vector<16x1xf32> to vector<16x16xf32>
    %50 = arith.subf %46, %49 : vector<16x16xf32>
    %51 = math.exp %50 : vector<16x16xf32>
    %cst_26 = arith.constant dense<0.000000e+00> : vector<16xf32>
    %52 = vector.multi_reduction <add>, %51, %cst_26 [1] : vector<16x16xf32> to vector<16xf32>
    %53 = vector.shape_cast %52 : vector<16xf32> to vector<16x1xf32>
    %54 = tpu.reciprocal %53 {approx = true} : vector<16x1xf32> -> vector<16x1xf32>
    %55 = vector.broadcast %54 : vector<16x1xf32> to vector<16x16xf32>
    %56 = arith.mulf %51, %55 : vector<16x16xf32>
    %57 = arith.truncf %56 : vector<16x16xf32> to vector<16x16xbf16>
    %cst_27 = arith.constant dense<0.000000e+00> : vector<16x8xf32>
    %58 = tpu.matmul %57, %44, %cst_27 {dimension_numbers = #tpu.dot_dimension_numbers<[1], [0], [0], [1], [0, 0, 1, 1], [], []>} : vector<16x16xbf16>, vector<16x8xbf16>, vector<16x8xf32> -> vector<16x8xf32>
    %59 = vector.extract_strided_slice %36 {offsets = [0, 8], sizes = [16, 8], strides = [1, 1]} : vector<16x48xf32> to vector<16x8xf32>
    %60 = arith.truncf %59 : vector<16x8xf32> to vector<16x8xbf16>
    %61 = vector.extract_strided_slice %36 {offsets = [0, 24], sizes = [16, 8], strides = [1, 1]} : vector<16x48xf32> to vector<16x8xf32>
    %62 = arith.truncf %61 : vector<16x8xf32> to vector<16x8xbf16>
    %63 = vector.extract_strided_slice %36 {offsets = [0, 40], sizes = [16, 8], strides = [1, 1]} : vector<16x48xf32> to vector<16x8xf32>
    %64 = arith.truncf %63 : vector<16x8xf32> to vector<16x8xbf16>
    %cst_28 = arith.constant dense<0.000000e+00> : vector<16x16xf32>
    %65 = tpu.matmul %60, %62, %cst_28 {dimension_numbers = #tpu.dot_dimension_numbers<[1], [1], [0], [0], [0, 0, 1, 0], [], []>} : vector<16x8xbf16>, vector<16x8xbf16>, vector<16x16xf32> -> vector<16x16xf32>
    %66 = arith.addf %65, %38 : vector<16x16xf32>
    %cst_29 = arith.constant dense<0xFF800000> : vector<16xf32>
    %67 = vector.multi_reduction <maximumf>, %66, %cst_29 [1] : vector<16x16xf32> to vector<16xf32>
    %68 = vector.shape_cast %67 : vector<16xf32> to vector<16x1xf32>
    %69 = vector.broadcast %68 : vector<16x1xf32> to vector<16x16xf32>
    %70 = arith.subf %66, %69 : vector<16x16xf32>
    %71 = math.exp %70 : vector<16x16xf32>
    %cst_30 = arith.constant dense<0.000000e+00> : vector<16xf32>
    %72 = vector.multi_reduction <add>, %71, %cst_30 [1] : vector<16x16xf32> to vector<16xf32>
    %73 = vector.shape_cast %72 : vector<16xf32> to vector<16x1xf32>
    %74 = tpu.reciprocal %73 {approx = true} : vector<16x1xf32> -> vector<16x1xf32>
    %75 = vector.broadcast %74 : vector<16x1xf32> to vector<16x16xf32>
    %76 = arith.mulf %71, %75 : vector<16x16xf32>
    %77 = arith.truncf %76 : vector<16x16xf32> to vector<16x16xbf16>
    %cst_31 = arith.constant dense<0.000000e+00> : vector<16x8xf32>
    %78 = tpu.matmul %77, %64, %cst_31 {dimension_numbers = #tpu.dot_dimension_numbers<[1], [0], [0], [1], [0, 0, 1, 1], [], []>} : vector<16x16xbf16>, vector<16x8xbf16>, vector<16x8xf32> -> vector<16x8xf32>
    %79 = tpu.concatenate %58, %78 in 1 : vector<16x8xf32>, vector<16x8xf32> -> vector<16x16xf32>
    %80 = arith.truncf %79 : vector<16x16xf32> to vector<16x16xbf16>
    %c0_32 = arith.constant 0 : index
    %c0_33 = arith.constant 0 : index
    %c0_34 = arith.constant 0 : index
    %81 = vector.load %arg9[%c0_32, %c0_33, %c0_34] : memref<2x16x16xbf16, #tpu.memory_space<vmem>>, vector<1x16x16xbf16>
    %82 = vector.shape_cast %81 : vector<1x16x16xbf16> to vector<16x16xbf16>
    %cst_35 = arith.constant dense<0.000000e+00> : vector<16x16xf32>
    %83 = tpu.matmul %80, %82, %cst_35 {dimension_numbers = #tpu.dot_dimension_numbers<[1], [0], [0], [1], [0, 0, 1, 1], [], []>} : vector<16x16xbf16>, vector<16x16xbf16>, vector<16x16xf32> -> vector<16x16xf32>
    %c0_36 = arith.constant 0 : index
    %c0_37 = arith.constant 0 : index
    %c0_38 = arith.constant 0 : index
    %84 = vector.load %arg10[%c0_36, %c0_37, %c0_38] : memref<2x1x16xf32, #tpu.memory_space<vmem>>, vector<1x1x16xf32>
    %85 = vector.shape_cast %84 : vector<1x1x16xf32> to vector<1x16xf32>
    %86 = vector.broadcast %85 : vector<1x16xf32> to vector<16x16xf32>
    %87 = arith.addf %83, %86 : vector<16x16xf32>
    %88 = arith.addf %6, %87 : vector<16x16xf32>
    %c0_39 = arith.constant 0 : index
    %c0_40 = arith.constant 0 : index
    %c0_41 = arith.constant 0 : index
    %89 = vector.load %arg12[%c0_39, %c0_40, %c0_41] : memref<2x1x16xf32, #tpu.memory_space<vmem>>, vector<1x1x16xf32>
    %90 = vector.shape_cast %89 : vector<1x1x16xf32> to vector<1x16xf32>
    %c0_42 = arith.constant 0 : index
    %c0_43 = arith.constant 0 : index
    %c0_44 = arith.constant 0 : index
    %91 = vector.load %arg13[%c0_42, %c0_43, %c0_44] : memref<2x1x16xf32, #tpu.memory_space<vmem>>, vector<1x1x16xf32>
    %92 = vector.shape_cast %91 : vector<1x1x16xf32> to vector<1x16xf32>
    %cst_45 = arith.constant dense<0.000000e+00> : vector<16xf32>
    %93 = vector.multi_reduction <add>, %88, %cst_45 [1] : vector<16x16xf32> to vector<16xf32>
    %94 = vector.shape_cast %93 : vector<16xf32> to vector<16x1xf32>
    %cst_46 = arith.constant 1.600000e+01 : f32
    %95 = vector.broadcast %cst_46 : f32 to vector<16x1xf32>
    %96 = arith.divf %94, %95 : vector<16x1xf32>
    %97 = vector.broadcast %96 : vector<16x1xf32> to vector<16x16xf32>
    %98 = arith.subf %88, %97 : vector<16x16xf32>
    %99 = arith.mulf %98, %98 : vector<16x16xf32>
    %cst_47 = arith.constant dense<0.000000e+00> : vector<16xf32>
    %100 = vector.multi_reduction <add>, %99, %cst_47 [1] : vector<16x16xf32> to vector<16xf32>
    %101 = vector.shape_cast %100 : vector<16xf32> to vector<16x1xf32>
    %cst_48 = arith.constant 1.600000e+01 : f32
    %102 = vector.broadcast %cst_48 : f32 to vector<16x1xf32>
    %103 = arith.divf %101, %102 : vector<16x1xf32>
    %104 = vector.broadcast %96 : vector<16x1xf32> to vector<16x16xf32>
    %105 = arith.subf %88, %104 : vector<16x16xf32>
    %cst_49 = arith.constant 9.99999974E-6 : f32
    %106 = vector.broadcast %cst_49 : f32 to vector<16x1xf32>
    %107 = arith.addf %103, %106 : vector<16x1xf32>
    %108 = math.rsqrt %107 : vector<16x1xf32>
    %109 = vector.broadcast %108 : vector<16x1xf32> to vector<16x16xf32>
    %110 = arith.mulf %105, %109 : vector<16x16xf32>
    %111 = vector.broadcast %90 : vector<1x16xf32> to vector<16x16xf32>
    %112 = arith.mulf %110, %111 : vector<16x16xf32>
    %113 = vector.broadcast %92 : vector<1x16xf32> to vector<16x16xf32>
    %114 = arith.addf %112, %113 : vector<16x16xf32>
    %115 = arith.truncf %114 : vector<16x16xf32> to vector<16x16xbf16>
    %c0_50 = arith.constant 0 : index
    %c0_51 = arith.constant 0 : index
    %c0_52 = arith.constant 0 : index
    %116 = vector.load %arg14[%c0_50, %c0_51, %c0_52] : memref<2x16x64xbf16, #tpu.memory_space<vmem>>, vector<1x16x64xbf16>
    %117 = vector.shape_cast %116 : vector<1x16x64xbf16> to vector<16x64xbf16>
    %cst_53 = arith.constant dense<0.000000e+00> : vector<16x64xf32>
    %118 = tpu.matmul %115, %117, %cst_53 {dimension_numbers = #tpu.dot_dimension_numbers<[1], [0], [0], [1], [0, 0, 1, 1], [], []>} : vector<16x16xbf16>, vector<16x64xbf16>, vector<16x64xf32> -> vector<16x64xf32>
    %c0_54 = arith.constant 0 : index
    %c0_55 = arith.constant 0 : index
    %c0_56 = arith.constant 0 : index
    %119 = vector.load %arg15[%c0_54, %c0_55, %c0_56] : memref<2x1x64xf32, #tpu.memory_space<vmem>>, vector<1x1x64xf32>
    %120 = vector.shape_cast %119 : vector<1x1x64xf32> to vector<1x64xf32>
    %121 = vector.broadcast %120 : vector<1x64xf32> to vector<16x64xf32>
    %122 = arith.addf %118, %121 : vector<16x64xf32>
    %cst_57 = arith.constant 5.000000e-01 : f32
    %123 = vector.broadcast %cst_57 : f32 to vector<16x64xf32>
    %124 = arith.mulf %123, %122 : vector<16x64xf32>
    %cst_58 = arith.constant 0.707106769 : f32
    %125 = vector.broadcast %cst_58 : f32 to vector<16x64xf32>
    %126 = arith.mulf %122, %125 : vector<16x64xf32>
    %127 = math.erf %126 : vector<16x64xf32>
    %cst_59 = arith.constant 1.000000e+00 : f32
    %128 = vector.broadcast %cst_59 : f32 to vector<16x64xf32>
    %129 = arith.addf %128, %127 : vector<16x64xf32>
    %130 = arith.mulf %124, %129 : vector<16x64xf32>
    %131 = arith.truncf %130 : vector<16x64xf32> to vector<16x64xbf16>
    %c0_60 = arith.constant 0 : index
    %c0_61 = arith.constant 0 : index
    %c0_62 = arith.constant 0 : index
    %132 = vector.load %arg16[%c0_60, %c0_61, %c0_62] : memref<2x64x16xbf16, #tpu.memory_space<vmem>>, vector<1x64x16xbf16>
    %133 = vector.shape_cast %132 : vector<1x64x16xbf16> to vector<64x16xbf16>
    %cst_63 = arith.constant dense<0.000000e+00> : vector<16x16xf32>
    %134 = tpu.matmul %131, %133, %cst_63 {dimension_numbers = #tpu.dot_dimension_numbers<[1], [0], [0], [1], [0, 0, 1, 1], [], []>} : vector<16x64xbf16>, vector<64x16xbf16>, vector<16x16xf32> -> vector<16x16xf32>
    %135 = arith.addf %88, %134 : vector<16x16xf32>
    %c0_64 = arith.constant 0 : index
    %c0_65 = arith.constant 0 : index
    %c0_66 = arith.constant 0 : index
    %136 = vector.load %arg17[%c0_64, %c0_65, %c0_66] : memref<2x1x16xf32, #tpu.memory_space<vmem>>, vector<1x1x16xf32>
    %137 = vector.shape_cast %136 : vector<1x1x16xf32> to vector<1x16xf32>
    %138 = vector.broadcast %137 : vector<1x16xf32> to vector<16x16xf32>
    %139 = arith.addf %135, %138 : vector<16x16xf32>
    %c1 = arith.constant 1 : index
    %c0_67 = arith.constant 0 : index
    %c0_68 = arith.constant 0 : index
    %140 = vector.load %arg6[%c1, %c0_67, %c0_68] : memref<2x1x16xf32, #tpu.memory_space<vmem>>, vector<1x1x16xf32>
    %141 = vector.shape_cast %140 : vector<1x1x16xf32> to vector<1x16xf32>
    %c1_69 = arith.constant 1 : index
    %c0_70 = arith.constant 0 : index
    %c0_71 = arith.constant 0 : index
    %142 = vector.load %arg7[%c1_69, %c0_70, %c0_71] : memref<2x1x16xf32, #tpu.memory_space<vmem>>, vector<1x1x16xf32>
    %143 = vector.shape_cast %142 : vector<1x1x16xf32> to vector<1x16xf32>
    %cst_72 = arith.constant dense<0.000000e+00> : vector<16xf32>
    %144 = vector.multi_reduction <add>, %139, %cst_72 [1] : vector<16x16xf32> to vector<16xf32>
    %145 = vector.shape_cast %144 : vector<16xf32> to vector<16x1xf32>
    %cst_73 = arith.constant 1.600000e+01 : f32
    %146 = vector.broadcast %cst_73 : f32 to vector<16x1xf32>
    %147 = arith.divf %145, %146 : vector<16x1xf32>
    %148 = vector.broadcast %147 : vector<16x1xf32> to vector<16x16xf32>
    %149 = arith.subf %139, %148 : vector<16x16xf32>
    %150 = arith.mulf %149, %149 : vector<16x16xf32>
    %cst_74 = arith.constant dense<0.000000e+00> : vector<16xf32>
    %151 = vector.multi_reduction <add>, %150, %cst_74 [1] : vector<16x16xf32> to vector<16xf32>
    %152 = vector.shape_cast %151 : vector<16xf32> to vector<16x1xf32>
    %cst_75 = arith.constant 1.600000e+01 : f32
    %153 = vector.broadcast %cst_75 : f32 to vector<16x1xf32>
    %154 = arith.divf %152, %153 : vector<16x1xf32>
    %155 = vector.broadcast %147 : vector<16x1xf32> to vector<16x16xf32>
    %156 = arith.subf %139, %155 : vector<16x16xf32>
    %cst_76 = arith.constant 9.99999974E-6 : f32
    %157 = vector.broadcast %cst_76 : f32 to vector<16x1xf32>
    %158 = arith.addf %154, %157 : vector<16x1xf32>
    %159 = math.rsqrt %158 : vector<16x1xf32>
    %160 = vector.broadcast %159 : vector<16x1xf32> to vector<16x16xf32>
    %161 = arith.mulf %156, %160 : vector<16x16xf32>
    %162 = vector.broadcast %141 : vector<1x16xf32> to vector<16x16xf32>
    %163 = arith.mulf %161, %162 : vector<16x16xf32>
    %164 = vector.broadcast %143 : vector<1x16xf32> to vector<16x16xf32>
    %165 = arith.addf %163, %164 : vector<16x16xf32>
    %c14_i32 = arith.constant 14 : i32
    %166 = tpu.dynamic_rotate %165 by %c14_i32 dim 0 : vector<16x16xf32>, i32 -> vector<16x16xf32>
    %167 = arith.truncf %166 : vector<16x16xf32> to vector<16x16xbf16>
    %c1_77 = arith.constant 1 : index
    %c0_78 = arith.constant 0 : index
    %c0_79 = arith.constant 0 : index
    %168 = vector.load %arg8[%c1_77, %c0_78, %c0_79] : memref<2x16x48xbf16, #tpu.memory_space<vmem>>, vector<1x16x48xbf16>
    %169 = vector.shape_cast %168 : vector<1x16x48xbf16> to vector<16x48xbf16>
    %cst_80 = arith.constant dense<0.000000e+00> : vector<16x48xf32>
    %170 = tpu.matmul %167, %169, %cst_80 {dimension_numbers = #tpu.dot_dimension_numbers<[1], [0], [0], [1], [0, 0, 1, 1], [], []>} : vector<16x16xbf16>, vector<16x48xbf16>, vector<16x48xf32> -> vector<16x48xf32>
    %c1_81 = arith.constant 1 : index
    %c0_82 = arith.constant 0 : index
    %c0_83 = arith.constant 0 : index
    %171 = vector.load %arg11[%c1_81, %c0_82, %c0_83] : memref<2x16x16xf32, #tpu.memory_space<vmem>>, vector<1x16x16xf32>
    %172 = vector.shape_cast %171 : vector<1x16x16xf32> to vector<16x16xf32>
    %173 = vector.extract_strided_slice %170 {offsets = [0, 0], sizes = [16, 8], strides = [1, 1]} : vector<16x48xf32> to vector<16x8xf32>
    %174 = arith.truncf %173 : vector<16x8xf32> to vector<16x8xbf16>
    %175 = vector.extract_strided_slice %170 {offsets = [0, 16], sizes = [16, 8], strides = [1, 1]} : vector<16x48xf32> to vector<16x8xf32>
    %176 = arith.truncf %175 : vector<16x8xf32> to vector<16x8xbf16>
    %177 = vector.extract_strided_slice %170 {offsets = [0, 32], sizes = [16, 8], strides = [1, 1]} : vector<16x48xf32> to vector<16x8xf32>
    %178 = arith.truncf %177 : vector<16x8xf32> to vector<16x8xbf16>
    %cst_84 = arith.constant dense<0.000000e+00> : vector<16x16xf32>
    %179 = tpu.matmul %174, %176, %cst_84 {dimension_numbers = #tpu.dot_dimension_numbers<[1], [1], [0], [0], [0, 0, 1, 0], [], []>} : vector<16x8xbf16>, vector<16x8xbf16>, vector<16x16xf32> -> vector<16x16xf32>
    %180 = arith.addf %179, %172 : vector<16x16xf32>
    %cst_85 = arith.constant dense<0xFF800000> : vector<16xf32>
    %181 = vector.multi_reduction <maximumf>, %180, %cst_85 [1] : vector<16x16xf32> to vector<16xf32>
    %182 = vector.shape_cast %181 : vector<16xf32> to vector<16x1xf32>
    %183 = vector.broadcast %182 : vector<16x1xf32> to vector<16x16xf32>
    %184 = arith.subf %180, %183 : vector<16x16xf32>
    %185 = math.exp %184 : vector<16x16xf32>
    %cst_86 = arith.constant dense<0.000000e+00> : vector<16xf32>
    %186 = vector.multi_reduction <add>, %185, %cst_86 [1] : vector<16x16xf32> to vector<16xf32>
    %187 = vector.shape_cast %186 : vector<16xf32> to vector<16x1xf32>
    %188 = tpu.reciprocal %187 {approx = true} : vector<16x1xf32> -> vector<16x1xf32>
    %189 = vector.broadcast %188 : vector<16x1xf32> to vector<16x16xf32>
    %190 = arith.mulf %185, %189 : vector<16x16xf32>
    %191 = arith.truncf %190 : vector<16x16xf32> to vector<16x16xbf16>
    %cst_87 = arith.constant dense<0.000000e+00> : vector<16x8xf32>
    %192 = tpu.matmul %191, %178, %cst_87 {dimension_numbers = #tpu.dot_dimension_numbers<[1], [0], [0], [1], [0, 0, 1, 1], [], []>} : vector<16x16xbf16>, vector<16x8xbf16>, vector<16x8xf32> -> vector<16x8xf32>
    %193 = vector.extract_strided_slice %170 {offsets = [0, 8], sizes = [16, 8], strides = [1, 1]} : vector<16x48xf32> to vector<16x8xf32>
    %194 = arith.truncf %193 : vector<16x8xf32> to vector<16x8xbf16>
    %195 = vector.extract_strided_slice %170 {offsets = [0, 24], sizes = [16, 8], strides = [1, 1]} : vector<16x48xf32> to vector<16x8xf32>
    %196 = arith.truncf %195 : vector<16x8xf32> to vector<16x8xbf16>
    %197 = vector.extract_strided_slice %170 {offsets = [0, 40], sizes = [16, 8], strides = [1, 1]} : vector<16x48xf32> to vector<16x8xf32>
    %198 = arith.truncf %197 : vector<16x8xf32> to vector<16x8xbf16>
    %cst_88 = arith.constant dense<0.000000e+00> : vector<16x16xf32>
    %199 = tpu.matmul %194, %196, %cst_88 {dimension_numbers = #tpu.dot_dimension_numbers<[1], [1], [0], [0], [0, 0, 1, 0], [], []>} : vector<16x8xbf16>, vector<16x8xbf16>, vector<16x16xf32> -> vector<16x16xf32>
    %200 = arith.addf %199, %172 : vector<16x16xf32>
    %cst_89 = arith.constant dense<0xFF800000> : vector<16xf32>
    %201 = vector.multi_reduction <maximumf>, %200, %cst_89 [1] : vector<16x16xf32> to vector<16xf32>
    %202 = vector.shape_cast %201 : vector<16xf32> to vector<16x1xf32>
    %203 = vector.broadcast %202 : vector<16x1xf32> to vector<16x16xf32>
    %204 = arith.subf %200, %203 : vector<16x16xf32>
    %205 = math.exp %204 : vector<16x16xf32>
    %cst_90 = arith.constant dense<0.000000e+00> : vector<16xf32>
    %206 = vector.multi_reduction <add>, %205, %cst_90 [1] : vector<16x16xf32> to vector<16xf32>
    %207 = vector.shape_cast %206 : vector<16xf32> to vector<16x1xf32>
    %208 = tpu.reciprocal %207 {approx = true} : vector<16x1xf32> -> vector<16x1xf32>
    %209 = vector.broadcast %208 : vector<16x1xf32> to vector<16x16xf32>
    %210 = arith.mulf %205, %209 : vector<16x16xf32>
    %211 = arith.truncf %210 : vector<16x16xf32> to vector<16x16xbf16>
    %cst_91 = arith.constant dense<0.000000e+00> : vector<16x8xf32>
    %212 = tpu.matmul %211, %198, %cst_91 {dimension_numbers = #tpu.dot_dimension_numbers<[1], [0], [0], [1], [0, 0, 1, 1], [], []>} : vector<16x16xbf16>, vector<16x8xbf16>, vector<16x8xf32> -> vector<16x8xf32>
    %213 = tpu.concatenate %192, %212 in 1 : vector<16x8xf32>, vector<16x8xf32> -> vector<16x16xf32>
    %214 = arith.truncf %213 : vector<16x16xf32> to vector<16x16xbf16>
    %c1_92 = arith.constant 1 : index
    %c0_93 = arith.constant 0 : index
    %c0_94 = arith.constant 0 : index
    %215 = vector.load %arg9[%c1_92, %c0_93, %c0_94] : memref<2x16x16xbf16, #tpu.memory_space<vmem>>, vector<1x16x16xbf16>
    %216 = vector.shape_cast %215 : vector<1x16x16xbf16> to vector<16x16xbf16>
    %cst_95 = arith.constant dense<0.000000e+00> : vector<16x16xf32>
    %217 = tpu.matmul %214, %216, %cst_95 {dimension_numbers = #tpu.dot_dimension_numbers<[1], [0], [0], [1], [0, 0, 1, 1], [], []>} : vector<16x16xbf16>, vector<16x16xbf16>, vector<16x16xf32> -> vector<16x16xf32>
    %c1_96 = arith.constant 1 : index
    %c0_97 = arith.constant 0 : index
    %c0_98 = arith.constant 0 : index
    %218 = vector.load %arg10[%c1_96, %c0_97, %c0_98] : memref<2x1x16xf32, #tpu.memory_space<vmem>>, vector<1x1x16xf32>
    %219 = vector.shape_cast %218 : vector<1x1x16xf32> to vector<1x16xf32>
    %220 = vector.broadcast %219 : vector<1x16xf32> to vector<16x16xf32>
    %221 = arith.addf %217, %220 : vector<16x16xf32>
    %222 = arith.addf %139, %221 : vector<16x16xf32>
    %c1_99 = arith.constant 1 : index
    %c0_100 = arith.constant 0 : index
    %c0_101 = arith.constant 0 : index
    %223 = vector.load %arg12[%c1_99, %c0_100, %c0_101] : memref<2x1x16xf32, #tpu.memory_space<vmem>>, vector<1x1x16xf32>
    %224 = vector.shape_cast %223 : vector<1x1x16xf32> to vector<1x16xf32>
    %c1_102 = arith.constant 1 : index
    %c0_103 = arith.constant 0 : index
    %c0_104 = arith.constant 0 : index
    %225 = vector.load %arg13[%c1_102, %c0_103, %c0_104] : memref<2x1x16xf32, #tpu.memory_space<vmem>>, vector<1x1x16xf32>
    %226 = vector.shape_cast %225 : vector<1x1x16xf32> to vector<1x16xf32>
    %cst_105 = arith.constant dense<0.000000e+00> : vector<16xf32>
    %227 = vector.multi_reduction <add>, %222, %cst_105 [1] : vector<16x16xf32> to vector<16xf32>
    %228 = vector.shape_cast %227 : vector<16xf32> to vector<16x1xf32>
    %cst_106 = arith.constant 1.600000e+01 : f32
    %229 = vector.broadcast %cst_106 : f32 to vector<16x1xf32>
    %230 = arith.divf %228, %229 : vector<16x1xf32>
    %231 = vector.broadcast %230 : vector<16x1xf32> to vector<16x16xf32>
    %232 = arith.subf %222, %231 : vector<16x16xf32>
    %233 = arith.mulf %232, %232 : vector<16x16xf32>
    %cst_107 = arith.constant dense<0.000000e+00> : vector<16xf32>
    %234 = vector.multi_reduction <add>, %233, %cst_107 [1] : vector<16x16xf32> to vector<16xf32>
    %235 = vector.shape_cast %234 : vector<16xf32> to vector<16x1xf32>
    %cst_108 = arith.constant 1.600000e+01 : f32
    %236 = vector.broadcast %cst_108 : f32 to vector<16x1xf32>
    %237 = arith.divf %235, %236 : vector<16x1xf32>
    %238 = vector.broadcast %230 : vector<16x1xf32> to vector<16x16xf32>
    %239 = arith.subf %222, %238 : vector<16x16xf32>
    %cst_109 = arith.constant 9.99999974E-6 : f32
    %240 = vector.broadcast %cst_109 : f32 to vector<16x1xf32>
    %241 = arith.addf %237, %240 : vector<16x1xf32>
    %242 = math.rsqrt %241 : vector<16x1xf32>
    %243 = vector.broadcast %242 : vector<16x1xf32> to vector<16x16xf32>
    %244 = arith.mulf %239, %243 : vector<16x16xf32>
    %245 = vector.broadcast %224 : vector<1x16xf32> to vector<16x16xf32>
    %246 = arith.mulf %244, %245 : vector<16x16xf32>
    %247 = vector.broadcast %226 : vector<1x16xf32> to vector<16x16xf32>
    %248 = arith.addf %246, %247 : vector<16x16xf32>
    %249 = arith.truncf %248 : vector<16x16xf32> to vector<16x16xbf16>
    %c1_110 = arith.constant 1 : index
    %c0_111 = arith.constant 0 : index
    %c0_112 = arith.constant 0 : index
    %250 = vector.load %arg14[%c1_110, %c0_111, %c0_112] : memref<2x16x64xbf16, #tpu.memory_space<vmem>>, vector<1x16x64xbf16>
    %251 = vector.shape_cast %250 : vector<1x16x64xbf16> to vector<16x64xbf16>
    %cst_113 = arith.constant dense<0.000000e+00> : vector<16x64xf32>
    %252 = tpu.matmul %249, %251, %cst_113 {dimension_numbers = #tpu.dot_dimension_numbers<[1], [0], [0], [1], [0, 0, 1, 1], [], []>} : vector<16x16xbf16>, vector<16x64xbf16>, vector<16x64xf32> -> vector<16x64xf32>
    %c1_114 = arith.constant 1 : index
    %c0_115 = arith.constant 0 : index
    %c0_116 = arith.constant 0 : index
    %253 = vector.load %arg15[%c1_114, %c0_115, %c0_116] : memref<2x1x64xf32, #tpu.memory_space<vmem>>, vector<1x1x64xf32>
    %254 = vector.shape_cast %253 : vector<1x1x64xf32> to vector<1x64xf32>
    %255 = vector.broadcast %254 : vector<1x64xf32> to vector<16x64xf32>
    %256 = arith.addf %252, %255 : vector<16x64xf32>
    %cst_117 = arith.constant 5.000000e-01 : f32
    %257 = vector.broadcast %cst_117 : f32 to vector<16x64xf32>
    %258 = arith.mulf %257, %256 : vector<16x64xf32>
    %cst_118 = arith.constant 0.707106769 : f32
    %259 = vector.broadcast %cst_118 : f32 to vector<16x64xf32>
    %260 = arith.mulf %256, %259 : vector<16x64xf32>
    %261 = math.erf %260 : vector<16x64xf32>
    %cst_119 = arith.constant 1.000000e+00 : f32
    %262 = vector.broadcast %cst_119 : f32 to vector<16x64xf32>
    %263 = arith.addf %262, %261 : vector<16x64xf32>
    %264 = arith.mulf %258, %263 : vector<16x64xf32>
    %265 = arith.truncf %264 : vector<16x64xf32> to vector<16x64xbf16>
    %c1_120 = arith.constant 1 : index
    %c0_121 = arith.constant 0 : index
    %c0_122 = arith.constant 0 : index
    %266 = vector.load %arg16[%c1_120, %c0_121, %c0_122] : memref<2x64x16xbf16, #tpu.memory_space<vmem>>, vector<1x64x16xbf16>
    %267 = vector.shape_cast %266 : vector<1x64x16xbf16> to vector<64x16xbf16>
    %cst_123 = arith.constant dense<0.000000e+00> : vector<16x16xf32>
    %268 = tpu.matmul %265, %267, %cst_123 {dimension_numbers = #tpu.dot_dimension_numbers<[1], [0], [0], [1], [0, 0, 1, 1], [], []>} : vector<16x64xbf16>, vector<64x16xbf16>, vector<16x16xf32> -> vector<16x16xf32>
    %269 = arith.addf %222, %268 : vector<16x16xf32>
    %c1_124 = arith.constant 1 : index
    %c0_125 = arith.constant 0 : index
    %c0_126 = arith.constant 0 : index
    %270 = vector.load %arg17[%c1_124, %c0_125, %c0_126] : memref<2x1x16xf32, #tpu.memory_space<vmem>>, vector<1x1x16xf32>
    %271 = vector.shape_cast %270 : vector<1x1x16xf32> to vector<1x16xf32>
    %272 = vector.broadcast %271 : vector<1x16xf32> to vector<16x16xf32>
    %273 = arith.addf %269, %272 : vector<16x16xf32>
    %c0_127 = arith.constant 0 : index
    %c0_128 = arith.constant 0 : index
    %c0_129 = arith.constant 0 : index
    %274 = vector.load %arg18[%c0_127, %c0_128, %c0_129] : memref<1x16x16xf32, #tpu.memory_space<vmem>>, vector<1x16x16xf32>
    %275 = vector.shape_cast %274 : vector<1x16x16xf32> to vector<16x16xf32>
    %276 = vector.shape_cast %273 : vector<16x16xf32> to vector<1x16x16xf32>
    tpu.vector_store %arg18[%c0_127, %c0_128, %c0_129], %276 {strides = array<i32>} : memref<1x16x16xf32, #tpu.memory_space<vmem>>, vector<1x16x16xf32>,
    return
  }
  func.func @transform_0(%arg0: i32) -> (i32, i32, i32) {
    %c0_i32 = arith.constant 0 : i32
    %c0_i32_0 = arith.constant 0 : i32
    %c0_i32_1 = arith.constant 0 : i32
    return %arg0, %c0_i32, %c0_i32_0 : i32, i32, i32
  }
  func.func @transform_1(%arg0: i32) -> (i32, i32) {
    %c0_i32 = arith.constant 0 : i32
    %c0_i32_0 = arith.constant 0 : i32
    %c0_i32_1 = arith.constant 0 : i32
    return %c0_i32, %c0_i32_0 : i32, i32
  }
  func.func @transform_2(%arg0: i32) -> (i32, i32) {
    %c0_i32 = arith.constant 0 : i32
    %c0_i32_0 = arith.constant 0 : i32
    %c0_i32_1 = arith.constant 0 : i32
    return %c0_i32, %c0_i32_0 : i32, i32
  }
  func.func @transform_3(%arg0: i32) -> (i32, i32) {
    %c0_i32 = arith.constant 0 : i32
    %c0_i32_0 = arith.constant 0 : i32
    %c0_i32_1 = arith.constant 0 : i32
    return %c0_i32, %c0_i32_0 : i32, i32
  }
  func.func @transform_4(%arg0: i32) -> (i32, i32) {
    %c0_i32 = arith.constant 0 : i32
    %c0_i32_0 = arith.constant 0 : i32
    %c0_i32_1 = arith.constant 0 : i32
    return %c0_i32, %c0_i32_0 : i32, i32
  }
  func.func @transform_5(%arg0: i32) -> (i32, i32, i32) {
    %c0_i32 = arith.constant 0 : i32
    %c0_i32_0 = arith.constant 0 : i32
    %c0_i32_1 = arith.constant 0 : i32
    %c0_i32_2 = arith.constant 0 : i32
    return %c0_i32, %c0_i32_0, %c0_i32_1 : i32, i32, i32
  }
  func.func @transform_6(%arg0: i32) -> (i32, i32, i32) {
    %c0_i32 = arith.constant 0 : i32
    %c0_i32_0 = arith.constant 0 : i32
    %c0_i32_1 = arith.constant 0 : i32
    %c0_i32_2 = arith.constant 0 : i32
    return %c0_i32, %c0_i32_0, %c0_i32_1 : i32, i32, i32
  }
  func.func @transform_7(%arg0: i32) -> (i32, i32, i32) {
    %c0_i32 = arith.constant 0 : i32
    %c0_i32_0 = arith.constant 0 : i32
    %c0_i32_1 = arith.constant 0 : i32
    %c0_i32_2 = arith.constant 0 : i32
    return %c0_i32, %c0_i32_0, %c0_i32_1 : i32, i32, i32
  }
  func.func @transform_8(%arg0: i32) -> (i32, i32, i32) {
    %c0_i32 = arith.constant 0 : i32
    %c0_i32_0 = arith.constant 0 : i32
    %c0_i32_1 = arith.constant 0 : i32
    %c0_i32_2 = arith.constant 0 : i32
    return %c0_i32, %c0_i32_0, %c0_i32_1 : i32, i32, i32
  }
  func.func @transform_9(%arg0: i32) -> (i32, i32, i32) {
    %c0_i32 = arith.constant 0 : i32
    %c0_i32_0 = arith.constant 0 : i32
    %c0_i32_1 = arith.constant 0 : i32
    %c0_i32_2 = arith.constant 0 : i32
    return %c0_i32, %c0_i32_0, %c0_i32_1 : i32, i32, i32
  }
  func.func @transform_10(%arg0: i32) -> (i32, i32, i32) {
    %c0_i32 = arith.constant 0 : i32
    %c0_i32_0 = arith.constant 0 : i32
    %c0_i32_1 = arith.constant 0 : i32
    %c0_i32_2 = arith.constant 0 : i32
    return %c0_i32, %c0_i32_0, %c0_i32_1 : i32, i32, i32
  }
  func.func @transform_11(%arg0: i32) -> (i32, i32, i32) {
    %c0_i32 = arith.constant 0 : i32
    %c0_i32_0 = arith.constant 0 : i32
    %c0_i32_1 = arith.constant 0 : i32
    %c0_i32_2 = arith.constant 0 : i32
    return %c0_i32, %c0_i32_0, %c0_i32_1 : i32, i32, i32
  }
  func.func @transform_12(%arg0: i32) -> (i32, i32, i32) {
    %c0_i32 = arith.constant 0 : i32
    %c0_i32_0 = arith.constant 0 : i32
    %c0_i32_1 = arith.constant 0 : i32
    %c0_i32_2 = arith.constant 0 : i32
    return %c0_i32, %c0_i32_0, %c0_i32_1 : i32, i32, i32
  }
  func.func @transform_13(%arg0: i32) -> (i32, i32, i32) {
    %c0_i32 = arith.constant 0 : i32
    %c0_i32_0 = arith.constant 0 : i32
    %c0_i32_1 = arith.constant 0 : i32
    %c0_i32_2 = arith.constant 0 : i32
    return %c0_i32, %c0_i32_0, %c0_i32_1 : i32, i32, i32
  }
  func.func @transform_14(%arg0: i32) -> (i32, i32, i32) {
    %c0_i32 = arith.constant 0 : i32
    %c0_i32_0 = arith.constant 0 : i32
    %c0_i32_1 = arith.constant 0 : i32
    %c0_i32_2 = arith.constant 0 : i32
    return %c0_i32, %c0_i32_0, %c0_i32_1 : i32, i32, i32
  }
  func.func @transform_15(%arg0: i32) -> (i32, i32, i32) {
    %c0_i32 = arith.constant 0 : i32
    %c0_i32_0 = arith.constant 0 : i32
    %c0_i32_1 = arith.constant 0 : i32
    %c0_i32_2 = arith.constant 0 : i32
    return %c0_i32, %c0_i32_0, %c0_i32_1 : i32, i32, i32
  }
  func.func @transform_16(%arg0: i32) -> (i32, i32, i32) {
    %c0_i32 = arith.constant 0 : i32
    %c0_i32_0 = arith.constant 0 : i32
    %c0_i32_1 = arith.constant 0 : i32
    %c0_i32_2 = arith.constant 0 : i32
    return %c0_i32, %c0_i32_0, %c0_i32_1 : i32, i32, i32
  }
  func.func @transform_17(%arg0: i32) -> (i32, i32, i32) {
    %c0_i32 = arith.constant 0 : i32
    %c0_i32_0 = arith.constant 0 : i32
    %c0_i32_1 = arith.constant 0 : i32
    return %arg0, %c0_i32, %c0_i32_0 : i32, i32, i32
  }
}

</mosaic_0001>

<bundles_post_ra>
// kernel: _lambda_.1
= control target key start
LH: loop header
LB: loop body
LE: loop exit
PB: predicated region body
PF: predicated region fallthrough
CT: control target
= control target key end

     0   :  { %s2437_s0 = inlined_call_operand.vmem [shape: bf16[2,16,8], index: 0, kind: input, shape index: {}]   ;;  %s2438_s1 = inlined_call_operand.hbm [shape: bf16[8,16], index: 1, kind: input, shape index: {}]   ;;  %s2439_s2 = inlined_call_operand.vmem [shape: f32[1,16], index: 2, kind: input, shape index: {}, may-alias: {2,4}]   ;;  %s2440_s3 = inlined_call_operand.vmem [shape: f32[1,16], index: 3, kind: input, shape index: {}]   ;;  %s2441_s4 = inlined_call_operand.vmem [shape: f32[1,16], index: 4, kind: input, shape index: {}, may-alias: {2,4}]   ;;  %s2442_s5 = inlined_call_operand.vmem [shape: f32[2,1,16], index: 5, kind: input, shape index: {}, may-alias: {5,11}]   ;;  %s2443_s6 = inlined_call_operand.vmem [shape: f32[2,1,16], index: 6, kind: input, shape index: {}, may-alias: {6,9,12,16}]   ;;  %s2444_s7 = inlined_call_operand.hbm [shape: bf16[2,16,48], index: 7, kind: input, shape index: {}]   ;;  %s2445_s8 = inlined_call_operand.vmem [shape: bf16[2,16,16], index: 8, kind: input, shape index: {}]   ;;  %s2446_s9 = inlined_call_operand.vmem [shape: f32[2,1,16], index: 9, kind: input, shape index: {}, may-alias: {6,9,12,16}]   ;;  %s2447_s10 = inlined_call_operand.vmem [shape: f32[2,16,16], index: 10, kind: input, shape index: {}]   ;;  %s2448_s11 = inlined_call_operand.vmem [shape: f32[2,1,16], index: 11, kind: input, shape index: {}, may-alias: {5,11}]   ;;  %s2449_s12 = inlined_call_operand.vmem [shape: f32[2,1,16], index: 12, kind: input, shape index: {}, may-alias: {6,9,12,16}]   ;;  %s2450_s13 = inlined_call_operand.vmem [shape: bf16[2,16,64], index: 13, kind: input, shape index: {}]   ;;  %s2451_s14 = inlined_call_operand.vmem [shape: f32[2,1,64], index: 14, kind: input, shape index: {}]   ;;  %s2452_s15 = inlined_call_operand.vmem [shape: bf16[2,64,16], index: 15, kind: input, shape index: {}]   ;;  %s2453_s16 = inlined_call_operand.vmem [shape: f32[2,1,16], index: 16, kind: input, shape index: {}, may-alias: {6,9,12,16}]   ;;  %s2454_s17 = inlined_call_operand.vmem [shape: f32[2,16,16], index: 17, kind: output, shape index: {}]  }
   0x1   :  { %2455 = sst [smem:[#allocation8_spill]] %s2437_s0 }
   0x2   :  { %2456 = sst [smem:[#allocation9_spill]] %s2438_s1 }
   0x3   :  { %22 = vsyncpa [#allocation3], 0 }
   0x4   :  { %23 = vsyncpa [#allocation5], 0  ;;  %s2139_s22 = smov 0  }
   0x5 LB: > { %s2457_s24 = sld [smem:[#allocation9_spill]]  ;;  %s1707_s25 = sadd.s32 4294967295, %s2036_s22   ;;  %s2036_s22 = sphi %s2139_s22, %s29_s22  }
   0x6   : > { %p1709_p0 = scmp.ge.s32.totalorder %s2036_s22, 1  ;;  %p422_p1 = scmp.lt.s32.totalorder %s2036_s22, 3 }
   0x7   : > { %p1856_p2 = scmp.eq.s32.totalorder %s1707_s25, 0  ;;  %s2038_s27 = smov [#allocation2]  }
   0x8   : > { %p2150_p3 = pnand %p1709_p0, %p422_p1  ;;  %s436_s0 = sshll.u32 %s2038_s27, 4  ;;  %s437_s0 = int_to_ptr.vmem [resolvable:$true] %s436_s0 }
   0x9   : > { %s460_s30 = sshll.u32 %s2444_s7, 4  ;;  %s2039_s1 = smov [#allocation4]   ;;  %s461_s30 = int_to_ptr.hbm [resolvable:$true] %s460_s30 }
   0xa   : > { %p1849_p4 = pneg %p2150_p3  ;;  %s462_s18 = sshll.u32 %s2039_s1, 4  ;;  %s463_s18 = int_to_ptr.vmem [resolvable:$true] %s462_s18 }
   0xb   : > { %s434_s4 = sshll.u32 %s2457_s24, 4  ;;  %s2040_s19 = smov 64   ;;  %s435_s4 = int_to_ptr.hbm [resolvable:$true] %s434_s4 }
   0xc   : > { %p1850_p5 = pnand %p1856_p2, %p1849_p4  ;;  %s2041_s20 = smov 4  }
   0xd   : > { %513 = sbr.rel (%p2150_p3) target bundleno = 3978 (0xf8a), region = 88 }
   0xe   : > { %1852 = dma.hbm_to_vmem [thread:$0]  (!%p1850_p5), %s435_s4, 64, %s437_s0, [#allocation3]  }
   0xf   : > { %1855 = dma.hbm_to_vmem [thread:$0]  (!%p1850_p5), %s461_s30, 256, %s463_s18, [#allocation5], %s2040_s19, %s2040_s19, %s2041_s20  }
  0x12   : > { %2027 = dma.done.wait (%p1856_p2), [#allocation3], 64  }
  0x13   : > { %2029 = vsyncadd (%p1856_p2), [#allocation3], 4294967232 }
  0x14   : > { %2031 = dma.done.wait (%p1856_p2), [#allocation5], 256  }
  0x15   : > { %2033 = vsyncadd (%p1856_p2), [#allocation5], 4294967040  ;;  %p571_p6 = scmp.lt.s32.totalorder %s1707_s25, 1  ;;  %vm598_vm0 = vcmask 1043456   ;;  %s2459_s24 = sld [smem:[#allocation8_spill]]  ;;  %vm594_vm1 = vcmask 64512  }
  0x16   : > { %v584_v0 = vld [vmem:[#allocation2] sm:$0xf]  ;;  %vm618_vm2 = vcmask 130048   ;;  %v2042_v10 = vmov 16.0   ;;  %v1827_v27 = vld [vmem:[#allocation4] sm:$0xff]  ;;  %s2043_s1 = smov 112  }
  0x17   : > { %s2461_s25 = smov (!%p571_p6, %s1707_s25), 1  ;;  %v600_v1 = vsel %vm598_vm0, %v584_v0, 0  ;;  %v1889_v3 = vld [vmem:[%s2439_s2] ss:$0 sm:$0xff]  ;;  %1904 = vrcp.f32 %v2042_v10  ;;  %699 = vmatpush.bf16.msra.mxu1 %v1827_v27  ;;  %s2044_s18 = smov 104  }
  0x18   : > { %s1824_s21 = sshll.u32 %s2461_s25, 3  ;;  %609 = vmatpush.bf16.msra.mxu0 %v600_v1  ;;  %v1890_v47 = vld [vmem:[%s2442_s5] ss:$0 sm:$0xff]  ;;  %s2045_s19 = smov 120  }
  0x19   : > { %v1891_v52 = vld [vmem:[%s2443_s6] ss:$0 sm:$0xff]  ;;  %s2048_s26 = smov 8   ;;  %s1825_s28 = sshll.u32 %s2461_s25, 4 }
  0x1a   : > { %v706_v1 = vld [vmem:[%s2447_s10] sm:$0xff]  ;;  %s580_s23 = scalar_lea.vmem %s2454_s17, %s1825_s28 }
  0x1b   : > { %s575_s4 = scalar_lea.vmem %s2459_s24, %s1824_s21  ;;  %s2046_s24 = smov 88  }
  0x1c   : > { %v1826_v2 = vld [vmem:[%s575_s4] sm:$0xff]  ;;  %s2047_s4 = smov 96  }
  0x1d   : > { %1724 = vmatmul.msk.bf16.vlgmr.msra.gmra.mxu0 %vm594_vm1, %v1826_v2  ;;  %v1905_v11 = vpop.eup %1904 }
  0x1e   : > { %v626_v12 = vmul.f32 16.0, %v1905_v11  ;;  %vm630_vm3 = vweird.f32 %v1905_v11 }
  0x20   : > { %v627_v13 = vsub.f32 1.0, %v626_v12 }
  0x22   : > { %v628_v14 = vmul.f32 %v1905_v11, %v627_v13 }
  0x24   : > { %v629_v15 = vadd.f32 %v1905_v11, %v628_v14 }
  0x26   : > { %v2184_v16 = vsel %vm630_vm3, %v1905_v11, %v629_v15 }
  0x9a   : > { %v611_v4 = vpop.f32.mrf.mxu0 }
  0x9b   : > { %v2176_v5 = vadd.f32 %v1889_v3, %v611_v4 }
  0x9d   : > { %v619_v6 = vsel %vm618_vm2, %v2176_v5, 0.0 }
  0x9e   : > { %620 = vadd.xlane.f32.xlu0 %v619_v6  ;;  %v707_v6 = vld [vmem:[%s2447_s10 + $0x8] sm:$0xff] }
  0xa2   : > { %v613_v7 = vpop.f32.mrf.mxu0 }
  0xa3   : > { %v2180_v8 = vadd.f32 %v1889_v3, %v613_v7 }
  0xa5   : > { %v622_v9 = vsel %vm618_vm2, %v2180_v8, 0.0 }
  0xa6   : > { %623 = vadd.xlane.f32.xlu0 %v622_v9 }
 0x111   : > { %v621_v17 = vpop.xlane.xlu0 %620 }
 0x112   : > { %v632_v18 = vmul.f32 %v2184_v16, %v621_v17 }
 0x114   : > { %v634_v19 = vsub.f32 %v2176_v5, %v632_v18 }
 0x116   : > { %v636_v20 = vmul.f32 %v634_v19, %v634_v19 }
 0x118   : > { %v638_v21 = vsel %vm618_vm2, %v636_v20, 0.0 }
 0x119   : > { %639 = vadd.xlane.f32.xlu1 %v638_v21  ;;  %v624_v22 = vpop.xlane.xlu0 %623 }
 0x11a   : > { %v633_v23 = vmul.f32 %v2184_v16, %v624_v22 }
 0x11c   : > { %v635_v24 = vsub.f32 %v2180_v8, %v633_v23 }
 0x11e   : > { %v637_v25 = vmul.f32 %v635_v24, %v635_v24 }
 0x120   : > { %v641_v26 = vsel %vm618_vm2, %v637_v25, 0.0 }
 0x121   : > { %642 = vadd.xlane.f32.xlu1 %v641_v26 }
 0x18c   : > { %v640_v28 = vpop.xlane.xlu1 %639 }
 0x18d   : > { %v644_v29 = vmul.f32 %v640_v28, %v2184_v16 }
 0x18f   : > { %v646_v30 = vadd.f32 1e-05, %v644_v29 }
 0x191   : > { %1906 = vrsqrt.f32 %v646_v30  ;;  %vm654_vm5 = vweird.f32 %v646_v30 }
 0x194   : > { %v643_v31 = vpop.xlane.xlu1 %642 }
 0x195   : > { %v645_v32 = vmul.f32 %v643_v31, %v2184_v16 }
 0x197   : > { %v1907_v33 = vpop.eup %1906  ;;  %v647_v34 = vadd.f32 1e-05, %v645_v32 }
 0x198   : > { %v649_v35 = vmul.f32 %v1907_v33, %v646_v30  ;;  %vm655_vm4 = vweird.f32 %v1907_v33 }
 0x199   : > { %1908 = vrsqrt.f32 %v647_v34  ;;  %vm656_vm6 = vmor %vm654_vm5, %vm655_vm4  ;;  %vm664_vm8 = vweird.f32 %v647_v34 }
 0x19a   : > { %v650_v36 = vmul.f32 %v1907_v33, %v649_v35 }
 0x19c   : > { %v651_v37 = vmul.f32 0.5, %v650_v36 }
 0x19e   : > { %v652_v38 = vsub.f32 1.5, %v651_v37 }
 0x19f   : > { %v1909_v39 = vpop.eup %1908 }
 0x1a0   : > { %v653_v40 = vmul.f32 %v1907_v33, %v652_v38  ;;  %v659_v41 = vmul.f32 %v1909_v39, %v647_v34  ;;  %vm665_vm7 = vweird.f32 %v1909_v39 }
 0x1a1   : > { %vm666_vm9 = vmor %vm664_vm8, %vm665_vm7 }
 0x1a2   : > { %v660_v42 = vmul.f32 %v1909_v39, %v659_v41  ;;  %v657_v43 = vsel %vm656_vm6, %v1907_v33, %v653_v40 }
 0x1a3   : > { %v668_v46 = vmul.f32 %v657_v43, %v634_v19 }
 0x1a4   : > { %v661_v44 = vmul.f32 0.5, %v660_v42 }
 0x1a5   : > { %v673_v51 = vmul.f32 %v1890_v47, %v668_v46 }
 0x1a6   : > { %v662_v45 = vsub.f32 1.5, %v661_v44 }
 0x1a7   : > { %v678_v54 = vadd.f32 %v1891_v52, %v673_v51 }
 0x1a8   : > { %v663_v48 = vmul.f32 %v1909_v39, %v662_v45 }
 0x1aa   : > { %v667_v49 = vsel %vm666_vm9, %v1909_v39, %v663_v48 }
 0x1ab   : > { %v669_v50 = vmul.f32 %v667_v49, %v635_v24 }
 0x1ad   : > { %v674_v53 = vmul.f32 %v1890_v47, %v669_v50 }
 0x1af   : > { %v679_v55 = vadd.f32 %v1891_v52, %v674_v53 }
 0x1b1   : > { %v680_v56 = vpack.c.bf16 %v679_v55, %v678_v54 }
 0x1b3   : > { %1729 = vmatmul.msk.bf16.vlgmr.msra.gmra.mxu1 %vm618_vm2, %v680_v56 }
 0x230   : > { %v701_v57 = vpop.f32.mrf.mxu1 }
 0x238   : > { %v703_v58 = vpop.f32.mrf.mxu1 }
 0x239   : > { %v708_v59 = vpack.c.bf16 %v703_v58, %v701_v57  ;;  %v1828_v57 = vld [vmem:[%s2445_s8] sm:$0xff] }
 0x23b   : > { %710 = vrot.lane.b32.xlu0 %v708_v59, %s2043_s1  ;;  %777 = vrot.lane.b32.xlu2 %v708_v59, %s2044_s18 }
 0x243   : > { %775 = vrot.lane.b32.xlu2 %v708_v59, %s2045_s19 }
 0x295   : > { %v778_v60 = vpop.permute.xlu2 %777 }
 0x296   : > { %v783_v61 = vsel %vm594_vm1, %v778_v60, 0 }
 0x297   : > { %792 = vmatpush.bf16.xpose.msrb.mxu0 %v783_v61 }
 0x29d   : > { %v776_v62 = vpop.permute.xlu2 %775 }
 0x29e   : > { %1732 = vmatmul.msk.bf16.vlgmr.msrb.gmra.mxu0 %vm594_vm1, %v776_v62 }
 0x2ad   : > { %v711_v63 = vpop.permute.xlu0 %710 }
 0x2ae   : > { %v716_v0 = vsel %vm594_vm1, %v711_v63, 0 }
 0x2af   : > { %725 = vmatpush.bf16.xpose.msra.mxu2 %v716_v0 }
 0x2b6   : > { %1730 = vmatmul.msk.bf16.vlgmr.msra.gmra.mxu2 %vm594_vm1, %v708_v59 }
 0x31b   : > { %v794_v2 = vpop.f32.mrf.mxu0 }
 0x31c   : > { %v795_v3 = vadd.f32 %v794_v2, %v706_v1  ;;  %v1892_v2 = vld [vmem:[%s2446_s9] ss:$0 sm:$0xff] }
 0x31e   : > { %v799_v4 = vsel %vm618_vm2, %v795_v3, -inf }
 0x31f   : > { %800 = vmax.xlane.f32.xlu1 %v799_v4 }
 0x323   : > { %v796_v7 = vpop.f32.mrf.mxu0 }
 0x324   : > { %v797_v9 = vadd.f32 %v796_v7, %v707_v6 }
 0x326   : > { %v802_v10 = vsel %vm618_vm2, %v797_v9, -inf }
 0x327   : > { %803 = vmax.xlane.f32.xlu2 %v802_v10 }
 0x339   : > { %v727_v11 = vpop.f32.mrf.mxu2 }
 0x33a   : > { %v728_v12 = vadd.f32 %v727_v11, %v706_v1 }
 0x33c   : > { %v732_v13 = vsel %vm618_vm2, %v728_v12, -inf }
 0x33d   : > { %733 = vmax.xlane.f32.xlu1 %v732_v13 }
 0x341   : > { %v729_v14 = vpop.f32.mrf.mxu2 }
 0x342   : > { %v730_v15 = vadd.f32 %v729_v14, %v707_v6 }
 0x344   : > { %v735_v17 = vsel %vm618_vm2, %v730_v15, -inf }
 0x345   : > { %736 = vmax.xlane.f32.xlu1 %v735_v17 }
 0x35e   : > { %822 = vrot.lane.b32.xlu1 %v708_v59, %s2046_s24 }
 0x392   : > { %v801_v18 = vpop.xlane.xlu1 %800 }
 0x393   : > { %v805_v19 = vsub.f32 %v795_v3, %v801_v18 }
 0x395   : > { %v807_v20 = vmul.f32 1.442695, %v805_v19 }
 0x397   : > { %1910 = vpow2.f32 %v807_v20 }
 0x39a   : > { %v804_v21 = vpop.xlane.xlu2 %803 }
 0x39b   : > { %v806_v22 = vsub.f32 %v797_v9, %v804_v21 }
 0x39d   : > { %v1911_v23 = vpop.eup %1910  ;;  %v809_v24 = vmul.f32 1.442695, %v806_v22  ;;  %v1829_v22 = vld [vmem:[%s2450_s13] sm:$0xff] }
 0x39e   : > { %v811_v25 = vsel %vm618_vm2, %v1911_v23, 0.0  ;;  %963 = vmatpush.bf16.msrb.mxu2 %v1829_v22 }
 0x39f   : > { %1912 = vpow2.f32 %v809_v24  ;;  %812 = vadd.xlane.f32.xlu0 %v811_v25 }
 0x3a5   : > { %v1913_v26 = vpop.eup %1912 }
 0x3a6   : > { %v814_v27 = vsel %vm618_vm2, %v1913_v26, 0.0 }
 0x3a7   : > { %815 = vadd.xlane.f32.xlu1 %v814_v27 }
 0x3b0   : > { %v734_v28 = vpop.xlane.xlu1 %733 }
 0x3b1   : > { %v738_v29 = vsub.f32 %v728_v12, %v734_v28 }
 0x3b3   : > { %v740_v30 = vmul.f32 1.442695, %v738_v29 }
 0x3b5   : > { %1914 = vpow2.f32 %v740_v30 }
 0x3b8   : > { %v737_v31 = vpop.xlane.xlu1 %736 }
 0x3b9   : > { %v739_v32 = vsub.f32 %v730_v15, %v737_v31 }
 0x3bb   : > { %v1915_v33 = vpop.eup %1914  ;;  %v742_v34 = vmul.f32 1.442695, %v739_v32 }
 0x3bc   : > { %v744_v35 = vsel %vm618_vm2, %v1915_v33, 0.0 }
 0x3bd   : > { %1916 = vpow2.f32 %v742_v34  ;;  %745 = vadd.xlane.f32.xlu2 %v744_v35 }
 0x3c0   : > { %755 = vrot.lane.b32.xlu1 %v708_v59, %s2047_s4 }
 0x3c3   : > { %v1917_v36 = vpop.eup %1916 }
 0x3c4   : > { %v747_v37 = vsel %vm618_vm2, %v1917_v36, 0.0 }
 0x3c5   : > { %748 = vadd.xlane.f32.xlu2 %v747_v37 }
 0x3d0   : > { %v823_v38 = vpop.permute.xlu1 %822 }
 0x3d1   : > { %835 = vmatpush.bf16.msrb.mxu1 %v823_v38 }
 0x412   : > { %v813_v39 = vpop.xlane.xlu0 %812 }
 0x413   : > { %1918 = vrcp.f32 %v813_v39 }
 0x419   : > { %v1919_v41 = vpop.eup %1918 }
 0x41a   : > { %v816_v40 = vpop.xlane.xlu1 %815  ;;  %v819_v43 = vmul.f32 %v1919_v41, %v1911_v23 }
 0x41b   : > { %1920 = vrcp.f32 %v816_v40 }
 0x421   : > { %v1921_v42 = vpop.eup %1920 }
 0x422   : > { %v820_v44 = vmul.f32 %v1921_v42, %v1913_v26  ;;  %v1893_v42 = vld [vmem:[%s2448_s11] ss:$0 sm:$0xff] }
 0x424   : > { %v821_v45 = vpack.c.bf16 %v820_v44, %v819_v43 }
 0x426   : > { %1733 = vmatmul.msk.bf16.vlgmr.msrb.gmra.mxu1 %vm618_vm2, %v821_v45 }
 0x430   : > { %v746_v46 = vpop.xlane.xlu2 %745 }
 0x431   : > { %1922 = vrcp.f32 %v746_v46 }
 0x432   : > { %v756_v47 = vpop.permute.xlu1 %755 }
 0x433   : > { %768 = vmatpush.bf16.msra.mxu3 %v756_v47  ;;  %v1894_v47 = vld [vmem:[%s2449_s12] ss:$0 sm:$0xff] }
 0x437   : > { %v1923_v49 = vpop.eup %1922  ;;  %875 = vmatpush.bf16.msrb.mxu3 %v1828_v57 }
 0x438   : > { %v749_v48 = vpop.xlane.xlu2 %748  ;;  %v752_v51 = vmul.f32 %v1923_v49, %v1915_v33 }
 0x439   : > { %1924 = vrcp.f32 %v749_v48 }
 0x43f   : > { %v1925_v50 = vpop.eup %1924 }
 0x440   : > { %v753_v52 = vmul.f32 %v1925_v50, %v1917_v36 }
 0x442   : > { %v754_v53 = vpack.c.bf16 %v753_v52, %v752_v51  ;;  %v1895_v52 = vld [vmem:[%s2451_s14] ss:$0 sm:$0xff] }
 0x444   : > { %1731 = vmatmul.msk.bf16.vlgmr.msra.gmra.mxu3 %vm618_vm2, %v754_v53 }
 0x4a3   : > { %v837_v54 = vpop.f32.mrf.mxu1 }
 0x4ab   : > { %v839_v55 = vpop.f32.mrf.mxu1 }
 0x4ac   : > { %v1879_v56 = vpack.i.bf16 %v839_v55, %v837_v54 }
 0x4ae   : > { %1880 = vrot.lane.b32.xlu2 %v1879_v56, %s2048_s26 }
 0x4c7   : > { %v770_v58 = vpop.f32.mrf.mxu3 }
 0x4cf   : > { %v772_v62 = vpop.f32.mrf.mxu3 }
 0x508   : > { %v1881_v59 = vpop.permute.xlu2 %1880 }
 0x509   : > { %v1883_v60 = vunpack.i.h.bf16 %v1881_v59  ;;  %v1882_v61 = vunpack.i.l.bf16 %v1881_v59 }
 0x50b   : > { %v850_v63 = vsel %vm594_vm1, %v770_v58, %v1882_v61  ;;  %v851_v0 = vsel %vm594_vm1, %v772_v62, %v1883_v60 }
 0x50c   : > { %v852_v1 = vpack.c.bf16 %v851_v0, %v850_v63 }
 0x50e   : > { %1738 = vmatmul.msk.bf16.vlgmr.msrb.gmra.mxu3 %vm618_vm2, %v852_v1 }
 0x591   : > { %v877_v3 = vpop.f32.mrf.mxu3 }
 0x592   : > { %v878_v4 = vadd.f32 %v1892_v2, %v877_v3 }
 0x594   : > { %v2237_v6 = vadd.f32 %v878_v4, %v2176_v5 }
 0x596   : > { %v886_v7 = vsel %vm618_vm2, %v2237_v6, 0.0 }
 0x597   : > { %887 = vadd.xlane.f32.xlu0 %v886_v7 }
 0x599   : > { %v879_v9 = vpop.f32.mrf.mxu3 }
 0x59a   : > { %v880_v10 = vadd.f32 %v1892_v2, %v879_v9 }
 0x59c   : > { %v2242_v11 = vadd.f32 %v880_v10, %v2180_v8  ;;  %v1833_v10 = vld [vmem:[%s2452_s15 + $0x18] sm:$0xff] }
 0x59d   : > { %1099 = vmatpush.bf16.msra.mxu0 %v1833_v10 }
 0x59e   : > { %v889_v12 = vsel %vm618_vm2, %v2242_v11, 0.0 }
 0x59f   : > { %890 = vadd.xlane.f32.xlu1 %v889_v12 }
 0x60a   : > { %v888_v13 = vpop.xlane.xlu0 %887 }
 0x60b   : > { %v892_v14 = vmul.f32 %v888_v13, %v2184_v16 }
 0x60d   : > { %v894_v15 = vsub.f32 %v2237_v6, %v892_v14 }
 0x60f   : > { %v896_v5 = vmul.f32 %v894_v15, %v894_v15 }
 0x611   : > { %v898_v17 = vsel %vm618_vm2, %v896_v5, 0.0 }
 0x612   : > { %v891_v18 = vpop.xlane.xlu1 %890  ;;  %899 = vadd.xlane.f32.xlu0 %v898_v17 }
 0x613   : > { %v893_v19 = vmul.f32 %v891_v18, %v2184_v16 }
 0x615   : > { %v895_v20 = vsub.f32 %v2242_v11, %v893_v19  ;;  %v1832_v19 = vld [vmem:[%s2452_s15 + $0x10] sm:$0xff] }
 0x616   : > { %1100 = vmatpush.bf16.msra.mxu0 %v1832_v19 }
 0x617   : > { %v897_v8 = vmul.f32 %v895_v20, %v895_v20 }
 0x619   : > { %v901_v21 = vsel %vm618_vm2, %v897_v8, 0.0 }
 0x61a   : > { %902 = vadd.xlane.f32.xlu0 %v901_v21 }
 0x685   : > { %v900_v23 = vpop.xlane.xlu0 %899 }
 0x686   : > { %v904_v24 = vmul.f32 %v900_v23, %v2184_v16 }
 0x688   : > { %v906_v25 = vadd.f32 1e-05, %v904_v24 }
 0x68a   : > { %1926 = vrsqrt.f32 %v906_v25  ;;  %vm914_vm11 = vweird.f32 %v906_v25 }
 0x68d   : > { %v903_v26 = vpop.xlane.xlu0 %902 }
 0x68e   : > { %v905_v27 = vmul.f32 %v903_v26, %v2184_v16  ;;  %v1831_v26 = vld [vmem:[%s2452_s15 + $0x8] sm:$0xff] }
 0x68f   : > { %1101 = vmatpush.bf16.msra.mxu0 %v1831_v26 }
 0x690   : > { %v1927_v28 = vpop.eup %1926  ;;  %v907_v29 = vadd.f32 1e-05, %v905_v27 }
 0x691   : > { %v909_v30 = vmul.f32 %v1927_v28, %v906_v25  ;;  %vm915_vm10 = vweird.f32 %v1927_v28 }
 0x692   : > { %1928 = vrsqrt.f32 %v907_v29  ;;  %vm916_vm12 = vmor %vm914_vm11, %vm915_vm10  ;;  %vm924_vm14 = vweird.f32 %v907_v29  ;;  %vm1091_vm10 = vcmask 523264  }
 0x693   : > { %v910_v31 = vmul.f32 %v1927_v28, %v909_v30 }
 0x695   : > { %v911_v32 = vmul.f32 0.5, %v910_v31 }
 0x697   : > { %v912_v33 = vsub.f32 1.5, %v911_v32  ;;  %v1830_v32 = vld [vmem:[%s2452_s15] sm:$0xff] }
 0x698   : > { %v1929_v34 = vpop.eup %1928  ;;  %1102 = vmatpush.bf16.msra.mxu0 %v1830_v32 }
 0x699   : > { %v913_v35 = vmul.f32 %v1927_v28, %v912_v33  ;;  %v919_v36 = vmul.f32 %v1929_v34, %v907_v29  ;;  %vm925_vm13 = vweird.f32 %v1929_v34 }
 0x69a   : > { %vm926_vm15 = vmor %vm924_vm14, %vm925_vm13 }
 0x69b   : > { %v920_v37 = vmul.f32 %v1929_v34, %v919_v36  ;;  %v917_v38 = vsel %vm916_vm12, %v1927_v28, %v913_v35 }
 0x69c   : > { %v928_v41 = vmul.f32 %v917_v38, %v894_v15 }
 0x69d   : > { %v921_v39 = vmul.f32 0.5, %v920_v37 }
 0x69e   : > { %v933_v46 = vmul.f32 %v1893_v42, %v928_v41 }
 0x69f   : > { %v922_v40 = vsub.f32 1.5, %v921_v39 }
 0x6a0   : > { %v938_v49 = vadd.f32 %v1894_v47, %v933_v46 }
 0x6a1   : > { %v923_v43 = vmul.f32 %v1929_v34, %v922_v40 }
 0x6a3   : > { %v927_v44 = vsel %vm926_vm15, %v1929_v34, %v923_v43 }
 0x6a4   : > { %v929_v45 = vmul.f32 %v927_v44, %v895_v20 }
 0x6a6   : > { %v934_v48 = vmul.f32 %v1893_v42, %v929_v45 }
 0x6a8   : > { %v939_v50 = vadd.f32 %v1894_v47, %v934_v48 }
 0x6aa   : > { %v940_v51 = vpack.c.bf16 %v939_v50, %v938_v49 }
 0x6ac   : > { %1743 = vmatmul.msk.bf16.vlgmr.msrb.gmra.mxu2 %vm618_vm2, %v940_v51 }
 0x72f   : > { %v965_v53 = vpop.f32.mrf.mxu2 }
 0x730   : > { %v2267_v54 = vadd.f32 %v1895_v52, %v965_v53 }
 0x732   : > { %v2270_v55 = vmul.f32 0.70710677, %v2267_v54 }
 0x734   : > { %v974_v56 = vmul.f32 %v2270_v55, %v2270_v55 }
 0x736   : > { %v975_v57 = vmin.f32 %v974_v56, 16.0 }
 0x737   : > { %v967_v58 = vpop.f32.mrf.mxu2 }
 0x738   : > { %v976_v59 = vmul.f32 2.1237322e-06, %v975_v57  ;;  %v987_v60 = vmul.f32 3.8918573e-05, %v975_v57  ;;  %v2274_v61 = vadd.f32 %v1895_v52, %v967_v58 }
 0x73a   : > { %v977_v62 = vadd.f32 0.00028619796, %v976_v59  ;;  %v988_v63 = vadd.f32 0.001143296, %v987_v60  ;;  %v2277_v0 = vmul.f32 0.70710677, %v2274_v61 }
 0x73c   : > { %v989_v1 = vmul.f32 %v988_v63, %v975_v57  ;;  %v1014_v2 = vmul.f32 %v2277_v0, %v2277_v0  ;;  %v978_v3 = vmul.f32 %v977_v62, %v975_v57 }
 0x73e   : > { %v990_v4 = vadd.f32 0.014752088, %v989_v1  ;;  %v1015_v7 = vmin.f32 %v1014_v2, 16.0  ;;  %v979_v14 = vadd.f32 0.0036580483, %v978_v3 }
 0x740   : > { %v991_v9 = vmul.f32 %v990_v4, %v975_v57  ;;  %v1016_v12 = vmul.f32 2.1237322e-06, %v1015_v7  ;;  %v1027_v13 = vmul.f32 3.8918573e-05, %v1015_v7  ;;  %v980_v21 = vmul.f32 %v979_v14, %v975_v57 }
 0x742   : > { %v992_v15 = vadd.f32 0.112945676, %v991_v9  ;;  %v1017_v5 = vadd.f32 0.00028619796, %v1016_v12  ;;  %v1028_v17 = vadd.f32 0.001143296, %v1027_v13 }
 0x743   : > { %v981_v28 = vadd.f32 0.05243302, %v980_v21 }
 0x744   : > { %v993_v18 = vmul.f32 %v992_v15, %v975_v57  ;;  %v1018_v20 = vmul.f32 %v1017_v5, %v1015_v7  ;;  %v1029_v8 = vmul.f32 %v1028_v17, %v1015_v7  ;;  %v970_v5 = vmul.f32 0.5, %v2267_v54 }
 0x745   : > { %v982_v34 = vmul.f32 %v981_v28, %v975_v57  ;;  %v971_v17 = vmul.f32 0.5, %v2274_v61 }
 0x746   : > { %v994_v22 = vadd.f32 0.4994258, %v993_v18  ;;  %v1019_v23 = vadd.f32 0.0036580483, %v1018_v20  ;;  %v1030_v24 = vadd.f32 0.014752088, %v1029_v8 }
 0x747   : > { %v983_v39 = vadd.f32 0.18741608, %v982_v34 }
 0x748   : > { %v995_v25 = vmul.f32 %v994_v22, %v975_v57  ;;  %v1031_v27 = vmul.f32 %v1030_v24, %v1015_v7  ;;  %v1020_v30 = vmul.f32 %v1019_v23, %v1015_v7 }
 0x749   : > { %v984_v44 = vmul.f32 %v983_v39, %v975_v57 }
 0x74a   : > { %v996_v29 = vadd.f32 1.0, %v995_v25  ;;  %v1032_v31 = vadd.f32 0.112945676, %v1031_v27  ;;  %v1021_v35 = vadd.f32 0.05243302, %v1020_v30 }
 0x74b   : > { %v985_v50 = vadd.f32 1.1283791, %v984_v44 }
 0x74c   : > { %1930 = vrcp.f32 %v996_v29  ;;  %v1033_v33 = vmul.f32 %v1032_v31, %v1015_v7  ;;  %v1022_v41 = vmul.f32 %v1021_v35, %v1015_v7  ;;  %v1008_v46 = vand.u32 2147483648, %v996_v29 }
 0x74d   : > { %v1006_v48 = vand.u32 2147483647, %v996_v29  ;;  %vm1002_vm3 = vweird.f32 %v996_v29  ;;  %v986_v60 = vmul.f32 %v985_v50, %v2270_v55 }
 0x74e   : > { %v1034_v36 = vadd.f32 0.4994258, %v1033_v33  ;;  %v1023_v47 = vadd.f32 0.18741608, %v1022_v41  ;;  %v1009_v53 = vor.u32 1.1754944e-38, %v1008_v46 }
 0x74f   : > { %vm1007_vm5 = vcmp.eq.f32.partialorder %v1006_v48, 8.507059e+37 }
 0x750   : > { %v1035_v37 = vmul.f32 %v1034_v36, %v1015_v7  ;;  %v1024_v56 = vmul.f32 %v1023_v47, %v1015_v7 }
 0x752   : > { %v1931_v38 = vpop.eup %1930  ;;  %v1036_v42 = vadd.f32 1.0, %v1035_v37  ;;  %v1025_v57 = vadd.f32 1.1283791, %v1024_v56 }
 0x753   : > { %v998_v40 = vmul.f32 %v1931_v38, %v996_v29  ;;  %vm1003_vm0 = vweird.f32 %v1931_v38 }
 0x754   : > { %1932 = vrcp.f32 %v1036_v42  ;;  %vm1004_vm4 = vmor %vm1002_vm3, %vm1003_vm0  ;;  %v1048_v63 = vand.u32 2147483648, %v1036_v42  ;;  %v1046_v3 = vand.u32 2147483647, %v1036_v42  ;;  %vm1042_vm7 = vweird.f32 %v1036_v42 }
 0x755   : > { %v999_v43 = vsub.f32 1.0, %v998_v40  ;;  %v1026_v12 = vmul.f32 %v1025_v57, %v2277_v0  ;;  %v1896_v0 = vld [vmem:[%s2453_s16] ss:$0 sm:$0xff] }
 0x756   : > { %v1049_v9 = vor.u32 1.1754944e-38, %v1048_v63  ;;  %vm1047_vm9 = vcmp.eq.f32.partialorder %v1046_v3, 8.507059e+37 }
 0x757   : > { %v1000_v45 = vmul.f32 %v1931_v38, %v999_v43 }
 0x759   : > { %v1001_v49 = vadd.f32 %v1931_v38, %v1000_v45 }
 0x75a   : > { %v1933_v51 = vpop.eup %1932 }
 0x75b   : > { %v1005_v52 = vsel %vm1004_vm4, %v1931_v38, %v1001_v49  ;;  %v1038_v58 = vmul.f32 %v1933_v51, %v1036_v42  ;;  %vm1043_vm6 = vweird.f32 %v1933_v51  ;;  %v1834_v38 = vld [vmem:[#allocation4 + $0x8] sm:$0xff] }
 0x75c   : > { %v1010_v59 = vsel %vm1007_vm5, %v1009_v53, %v1005_v52  ;;  %vm1044_vm8 = vmor %vm1042_vm7, %vm1043_vm6  ;;  %1202 = vmatpush.bf16.msra.mxu1 %v1834_v38  ;;  %v1897_v53 = vld [vmem:[%s2442_s5 + $0x1] ss:$0 sm:$0xff] }
 0x75d   : > { %v1039_v62 = vsub.f32 1.0, %v1038_v58  ;;  %v1011_v1 = vmul.f32 %v1010_v59, %v986_v60  ;;  %v1177_v60 = vlaneseq }
 0x75f   : > { %v1040_v2 = vmul.f32 %v1933_v51, %v1039_v62  ;;  %v1744_v10 = vclamps-f32 %v1011_v1, 1.0  ;;  %v1898_v62 = vld [vmem:[%s2443_s6 + $0x1] ss:$0 sm:$0xff] }
 0x761   : > { %v1041_v4 = vadd.f32 %v1933_v51, %v1040_v2  ;;  %v1054_v15 = vadd.f32 1.0, %v1744_v10  ;;  %v1178_v2 = vshrl.u32 %v1177_v60, 7 }
 0x763   : > { %v1045_v7 = vsel %vm1044_vm8, %v1933_v51, %v1041_v4  ;;  %v1056_v19 = vmul.f32 %v1054_v15, %v970_v5  ;;  %vm1179_vm3 = vcmp.lt.s32.totalorder %v1178_v2, 6 }
 0x764   : > { %v1050_v13 = vsel %vm1047_vm9, %v1049_v9, %v1045_v7 }
 0x765   : > { %v1051_v14 = vmul.f32 %v1050_v13, %v1026_v12 }
 0x767   : > { %v1745_v55 = vclamps-f32 %v1051_v14, 1.0 }
 0x769   : > { %v1055_v18 = vadd.f32 1.0, %v1745_v55 }
 0x76b   : > { %v1057_v20 = vmul.f32 %v1055_v18, %v971_v17 }
 0x76d   : > { %v1058_v8 = vpack.c.bf16 %v1057_v20, %v1056_v19 }
 0x76f   : > { %1762 = vmatmul.msk.bf16.vlgmr.msra.gmra.mxu0 %vm1091_vm10, %v1058_v8 }
 0x7ec   : > { %v1104_v21 = vpop.f32.mrf.mxu0 }
 0x7ed   : > { %v1109_v22 = vadd.f32 %v1104_v21, %v2237_v6 }
 0x7ef   : > { %v2302_v23 = vadd.f32 %v1896_v0, %v1109_v22 }
 0x7f1   : > { %v1121_v54 = vsel %vm618_vm2, %v2302_v23, 0.0 }
 0x7f2   : > { %1122 = vadd.xlane.f32.xlu2 %v1121_v54 }
 0x7f4   : > { %v1106_v61 = vpop.f32.mrf.mxu0 }
 0x7f5   : > { %v1110_v24 = vadd.f32 %v1106_v61, %v2242_v11 }
 0x7f7   : > { %v2307_v25 = vadd.f32 %v1896_v0, %v1110_v24  ;;  %v1770_v0 = vld [vmem:[%s2447_s10 + $0x10] sm:$0xff] }
 0x7f9   : > { %v1124_v26 = vsel %vm618_vm2, %v2307_v25, 0.0 }
 0x7fa   : > { %1125 = vadd.xlane.f32.xlu0 %v1124_v26 }
 0x865   : > { %v1123_v27 = vpop.xlane.xlu2 %1122 }
 0x866   : > { %v1127_v28 = vmul.f32 %v1123_v27, %v2184_v16  ;;  %v1771_v27 = vld [vmem:[%s2447_s10 + $0x18] sm:$0xff] }
 0x868   : > { %v1129_v6 = vsub.f32 %v2302_v23, %v1127_v28 }
 0x86a   : > { %v1131_v29 = vmul.f32 %v1129_v6, %v1129_v6 }
 0x86c   : > { %v1133_v30 = vsel %vm618_vm2, %v1131_v29, 0.0 }
 0x86d   : > { %1134 = vadd.xlane.f32.xlu0 %v1133_v30  ;;  %v1126_v31 = vpop.xlane.xlu0 %1125 }
 0x86e   : > { %v1128_v32 = vmul.f32 %v1126_v31, %v2184_v16 }
 0x870   : > { %v1130_v11 = vsub.f32 %v2307_v25, %v1128_v32 }
 0x872   : > { %v1132_v33 = vmul.f32 %v1130_v11, %v1130_v11 }
 0x874   : > { %v1136_v34 = vsel %vm618_vm2, %v1132_v33, 0.0 }
 0x875   : > { %1137 = vadd.xlane.f32.xlu0 %v1136_v34 }
 0x8e0   : > { %v1135_v35 = vpop.xlane.xlu0 %1134 }
 0x8e1   : > { %v1139_v36 = vmul.f32 %v1135_v35, %v2184_v16 }
 0x8e3   : > { %v1141_v37 = vadd.f32 1e-05, %v1139_v36 }
 0x8e5   : > { %1934 = vrsqrt.f32 %v1141_v37  ;;  %vm1149_vm12 = vweird.f32 %v1141_v37 }
 0x8e8   : > { %v1138_v39 = vpop.xlane.xlu0 %1137 }
 0x8e9   : > { %v1140_v40 = vmul.f32 %v1138_v39, %v2184_v16 }
 0x8eb   : > { %v1935_v41 = vpop.eup %1934  ;;  %v1142_v42 = vadd.f32 1e-05, %v1140_v40 }
 0x8ec   : > { %v1144_v43 = vmul.f32 %v1935_v41, %v1141_v37  ;;  %vm1150_vm11 = vweird.f32 %v1935_v41 }
 0x8ed   : > { %1936 = vrsqrt.f32 %v1142_v42  ;;  %vm1151_vm13 = vmor %vm1149_vm12, %vm1150_vm11  ;;  %vm1159_vm15 = vweird.f32 %v1142_v42 }
 0x8ee   : > { %v1145_v44 = vmul.f32 %v1935_v41, %v1144_v43 }
 0x8f0   : > { %v1146_v45 = vmul.f32 0.5, %v1145_v44 }
 0x8f2   : > { %v1147_v46 = vsub.f32 1.5, %v1146_v45 }
 0x8f3   : > { %v1937_v47 = vpop.eup %1936 }
 0x8f4   : > { %v1148_v48 = vmul.f32 %v1935_v41, %v1147_v46  ;;  %v1154_v49 = vmul.f32 %v1937_v47, %v1142_v42  ;;  %vm1160_vm14 = vweird.f32 %v1937_v47 }
 0x8f5   : > { %vm1161_vm0 = vmor %vm1159_vm15, %vm1160_vm14 }
 0x8f6   : > { %v1152_v50 = vsel %vm1151_vm13, %v1935_v41, %v1148_v48  ;;  %v1155_v51 = vmul.f32 %v1937_v47, %v1154_v49 }
 0x8f7   : > { %v1163_v56 = vmul.f32 %v1152_v50, %v1129_v6 }
 0x8f8   : > { %v1156_v52 = vmul.f32 0.5, %v1155_v51 }
 0x8f9   : > { %v1168_v57 = vmul.f32 %v1897_v53, %v1163_v56 }
 0x8fa   : > { %v1157_v58 = vsub.f32 1.5, %v1156_v52 }
 0x8fb   : > { %v1173_v3 = vadd.f32 %v1898_v62, %v1168_v57 }
 0x8fc   : > { %v1158_v59 = vmul.f32 %v1937_v47, %v1157_v58 }
 0x8fd   : > { %v1175_v10 = vrot.slane %v1173_v3, 2 }
 0x8fe   : > { %v1162_v63 = vsel %vm1161_vm0, %v1937_v47, %v1158_v59 }
 0x8ff   : > { %v1164_v1 = vmul.f32 %v1162_v63, %v1130_v11 }
 0x901   : > { %v1169_v4 = vmul.f32 %v1897_v53, %v1164_v1 }
 0x903   : > { %v1174_v9 = vadd.f32 %v1898_v62, %v1169_v4 }
 0x905   : > { %v1176_v12 = vrot.slane %v1174_v9, 2 }
 0x907   : > { %v1180_v7 = vsel %vm1179_vm3, %v1175_v10, %v1176_v12  ;;  %v1181_v13 = vsel %vm1179_vm3, %v1176_v12, %v1175_v10 }
 0x908   : > { %v1182_v14 = vpack.c.bf16 %v1181_v13, %v1180_v7 }
 0x90a   : > { %1769 = vmatmul.msk.bf16.vlgmr.msra.gmra.mxu1 %vm618_vm2, %v1182_v14 }
 0x987   : > { %v1204_v15 = vpop.f32.mrf.mxu1 }
 0x98f   : > { %v1206_v55 = vpop.f32.mrf.mxu1 }
 0x990   : > { %v1212_v5 = vpack.c.bf16 %v1206_v55, %v1204_v15  ;;  %v1835_v15 = vld [vmem:[%s2445_s8 + $0x8] sm:$0xff] }
 0x992   : > { %1214 = vrot.lane.b32.xlu2 %v1212_v5, %s2043_s1  ;;  %1279 = vrot.lane.b32.xlu0 %v1212_v5, %s2045_s19 }
 0x993   : > { %1281 = vrot.lane.b32.xlu1 %v1212_v5, %s2044_s18 }
 0x9ec   : > { %v1215_v17 = vpop.permute.xlu2 %1214 }
 0x9ed   : > { %v1220_v18 = vsel %vm594_vm1, %v1215_v17, 0 }
 0x9ee   : > { %1229 = vmatpush.bf16.xpose.msra.mxu3 %v1220_v18 }
 0x9f5   : > { %1772 = vmatmul.msk.bf16.vlgmr.msra.gmra.mxu3 %vm594_vm1, %v1212_v5 }
 0x9f6   : > { %1381 = vmatpush.bf16.msrb.mxu3 %v1835_v15 }
 0xa04   : > { %v1280_v8 = vpop.permute.xlu0 %1279 }
 0xa05   : > { %v1282_v19 = vpop.permute.xlu1 %1281 }
 0xa06   : > { %v1287_v20 = vsel %vm594_vm1, %v1282_v19, 0 }
 0xa07   : > { %1296 = vmatpush.bf16.xpose.msrb.mxu0 %v1287_v20 }
 0xa0e   : > { %1774 = vmatmul.msk.bf16.vlgmr.msrb.gmra.mxu0 %vm594_vm1, %v1280_v8 }
 0xa78   : > { %v1231_v21 = vpop.f32.mrf.mxu3 }
 0xa79   : > { %v1232_v22 = vadd.f32 %v1770_v0, %v1231_v21  ;;  %v1899_v21 = vld [vmem:[%s2446_s9 + $0x1] ss:$0 sm:$0xff] }
 0xa7b   : > { %v1236_v54 = vsel %vm618_vm2, %v1232_v22, -inf }
 0xa7c   : > { %1237 = vmax.xlane.f32.xlu2 %v1236_v54 }
 0xa80   : > { %v1233_v28 = vpop.f32.mrf.mxu3 }
 0xa81   : > { %v1234_v6 = vadd.f32 %v1771_v27, %v1233_v28 }
 0xa83   : > { %v1239_v32 = vsel %vm618_vm2, %v1234_v6, -inf }
 0xa8b   : > { %v1298_v61 = vpop.f32.mrf.mxu0 }
 0xa8c   : > { %v1299_v24 = vadd.f32 %v1770_v0, %v1298_v61 }
 0xa8e   : > { %v1303_v26 = vsel %vm618_vm2, %v1299_v24, -inf }
 0xa8f   : > { %1304 = vmax.xlane.f32.xlu0 %v1303_v26 }
 0xa93   : > { %v1300_v29 = vpop.f32.mrf.mxu0 }
 0xa94   : > { %v1301_v30 = vadd.f32 %v1771_v27, %v1300_v29 }
 0xa96   : > { %v1306_v31 = vsel %vm618_vm2, %v1301_v30, -inf }
 0xa97   : > { %1307 = vmax.xlane.f32.xlu1 %v1306_v31  ;;  %1240 = vmax.xlane.f32.xlu0 %v1239_v32 }
 0xaef   : > { %v1238_v11 = vpop.xlane.xlu2 %1237 }
 0xaf0   : > { %v1242_v33 = vsub.f32 %v1232_v22, %v1238_v11 }
 0xaf2   : > { %v1244_v34 = vmul.f32 1.442695, %v1242_v33 }
 0xaf4   : > { %1938 = vpow2.f32 %v1244_v34 }
 0xafa   : > { %v1939_v35 = vpop.eup %1938 }
 0xafb   : > { %v1248_v36 = vsel %vm618_vm2, %v1939_v35, 0.0 }
 0xafc   : > { %1249 = vadd.xlane.f32.xlu2 %v1248_v36 }
 0xb02   : > { %v1305_v37 = vpop.xlane.xlu0 %1304 }
 0xb03   : > { %v1309_v38 = vsub.f32 %v1299_v24, %v1305_v37 }
 0xb05   : > { %v1311_v39 = vmul.f32 1.442695, %v1309_v38 }
 0xb07   : > { %1940 = vpow2.f32 %v1311_v39  ;;  %v1836_v39 = vld [vmem:[%s2450_s13 + $0x8] sm:$0xff] }
 0xb0a   : > { %v1308_v40 = vpop.xlane.xlu1 %1307  ;;  %v1241_v41 = vpop.xlane.xlu0 %1240 }
 0xb0b   : > { %v1310_v42 = vsub.f32 %v1301_v30, %v1308_v40  ;;  %v1243_v45 = vsub.f32 %v1234_v6, %v1241_v41 }
 0xb0d   : > { %v1941_v43 = vpop.eup %1940  ;;  %v1313_v44 = vmul.f32 1.442695, %v1310_v42  ;;  %v1246_v47 = vmul.f32 1.442695, %v1243_v45 }
 0xb0e   : > { %v1315_v46 = vsel %vm618_vm2, %v1941_v43, 0.0 }
 0xb0f   : > { %1942 = vpow2.f32 %v1313_v44  ;;  %1316 = vadd.xlane.f32.xlu1 %v1315_v46 }
 0xb10   : > { %1944 = vpow2.f32 %v1246_v47 }
 0xb14   : > { %1259 = vrot.lane.b32.xlu2 %v1212_v5, %s2047_s4 }
 0xb15   : > { %v1943_v48 = vpop.eup %1942 }
 0xb16   : > { %v1318_v49 = vsel %vm618_vm2, %v1943_v48, 0.0  ;;  %v1945_v50 = vpop.eup %1944 }
 0xb17   : > { %1319 = vadd.xlane.f32.xlu0 %v1318_v49  ;;  %v1251_v51 = vsel %vm618_vm2, %v1945_v50, 0.0 }
 0xb1f   : > { %1252 = vadd.xlane.f32.xlu0 %v1251_v51 }
 0xb28   : > { %1326 = vrot.lane.b32.xlu1 %v1212_v5, %s2046_s24 }
 0xb6f   : > { %v1250_v52 = vpop.xlane.xlu2 %1249 }
 0xb77   : > { %v1260_v53 = vpop.permute.xlu2 %1259 }
 0xb78   : > { %1272 = vmatpush.bf16.msra.mxu2 %v1260_v53 }
 0xb7c   : > { %1473 = vmatpush.bf16.msrb.mxu2 %v1836_v39  ;;  %v1838_v39 = vld [vmem:[%s2452_s15 + $0x28] sm:$0xff] }
 0xb82   : > { %v1317_v58 = vpop.xlane.xlu1 %1316 }
 0xb8a   : > { %v1320_v56 = vpop.xlane.xlu0 %1319 }
 0xb8b   : > { %1946 = vrcp.f32 %v1320_v56 }
 0xb8c   : > { %1948 = vrcp.f32 %v1250_v52 }
 0xb8d   : > { %1950 = vrcp.f32 %v1317_v58 }
 0xb91   : > { %v1947_v60 = vpop.eup %1946 }
 0xb92   : > { %v1253_v59 = vpop.xlane.xlu0 %1252  ;;  %v1949_v62 = vpop.eup %1948  ;;  %v1324_v63 = vmul.f32 %v1947_v60, %v1943_v48 }
 0xb93   : > { %1952 = vrcp.f32 %v1253_v59  ;;  %v1951_v57 = vpop.eup %1950  ;;  %v1256_v2 = vmul.f32 %v1949_v62, %v1939_v35  ;;  %v1901_v62 = vld [vmem:[%s2449_s12 + $0x1] ss:$0 sm:$0xff] }
 0xb94   : > { %v1323_v3 = vmul.f32 %v1951_v57, %v1941_v43 }
 0xb96   : > { %v1325_v10 = vpack.c.bf16 %v1324_v63, %v1323_v3 }
 0xb99   : > { %v1953_v1 = vpop.eup %1952 }
 0xb9a   : > { %v1257_v4 = vmul.f32 %v1953_v1, %v1945_v50  ;;  %v1327_v9 = vpop.permute.xlu1 %1326 }
 0xb9b   : > { %1339 = vmatpush.bf16.msrb.mxu1 %v1327_v9  ;;  %v1902_v9 = vld [vmem:[%s2451_s14 + $0x1] ss:$0 sm:$0xff] }
 0xb9c   : > { %v1258_v12 = vpack.c.bf16 %v1257_v4, %v1256_v2 }
 0xb9e   : > { %1773 = vmatmul.msk.bf16.vlgmr.msra.gmra.mxu2 %vm618_vm2, %v1258_v12  ;;  %1775 = vmatmul.msk.bf16.vlgmr.msrb.gmra.mxu1 %vm618_vm2, %v1325_v10 }
 0xc1b   : > { %v1341_v7 = vpop.f32.mrf.mxu1 }
 0xc21   : > { %v1274_v55 = vpop.f32.mrf.mxu2 }
 0xc23   : > { %v1343_v13 = vpop.f32.mrf.mxu1 }
 0xc24   : > { %v1884_v14 = vpack.i.bf16 %v1343_v13, %v1341_v7 }
 0xc26   : > { %1885 = vrot.lane.b32.xlu0 %v1884_v14, %s2048_s26 }
 0xc29   : > { %v1276_v19 = vpop.f32.mrf.mxu2 }
 0xc98   : > { %v1886_v5 = vpop.permute.xlu0 %1885 }
 0xc99   : > { %v1888_v17 = vunpack.i.h.bf16 %v1886_v5  ;;  %v1887_v18 = vunpack.i.l.bf16 %v1886_v5 }
 0xc9b   : > { %v1355_v20 = vsel %vm594_vm1, %v1276_v19, %v1888_v17  ;;  %v1354_v8 = vsel %vm594_vm1, %v1274_v55, %v1887_v18 }
 0xc9c   : > { %v1356_v0 = vpack.c.bf16 %v1355_v20, %v1354_v8 }
 0xc9e   : > { %1783 = vmatmul.msk.bf16.vlgmr.msrb.gmra.mxu3 %vm618_vm2, %v1356_v0 }
 0xd21   : > { %v1383_v22 = vpop.f32.mrf.mxu3 }
 0xd22   : > { %v1384_v54 = vadd.f32 %v1899_v21, %v1383_v22 }
 0xd24   : > { %v2362_v61 = vadd.f32 %v1384_v54, %v2302_v23 }
 0xd26   : > { %v1394_v24 = vsel %vm618_vm2, %v2362_v61, 0.0 }
 0xd27   : > { %1395 = vadd.xlane.f32.xlu1 %v1394_v24 }
 0xd29   : > { %v1385_v26 = vpop.f32.mrf.mxu3 }
 0xd2a   : > { %v1386_v27 = vadd.f32 %v1899_v21, %v1385_v26  ;;  %v1840_v26 = vld [vmem:[%s2452_s15 + $0x38] sm:$0xff] }
 0xd2b   : > { %1609 = vmatpush.bf16.msra.mxu0 %v1840_v26 }
 0xd2c   : > { %v2367_v28 = vadd.f32 %v1386_v27, %v2307_v25 }
 0xd2e   : > { %v1397_v6 = vsel %vm618_vm2, %v2367_v28, 0.0 }
 0xd2f   : > { %1398 = vadd.xlane.f32.xlu0 %v1397_v6 }
 0xd9a   : > { %v1396_v29 = vpop.xlane.xlu1 %1395 }
 0xd9b   : > { %v1400_v30 = vmul.f32 %v1396_v29, %v2184_v16 }
 0xd9d   : > { %v1402_v31 = vsub.f32 %v2362_v61, %v1400_v30 }
 0xd9f   : > { %v1404_v23 = vmul.f32 %v1402_v31, %v1402_v31 }
 0xda1   : > { %v1406_v32 = vsel %vm618_vm2, %v1404_v23, 0.0 }
 0xda2   : > { %v1399_v11 = vpop.xlane.xlu0 %1398  ;;  %1407 = vadd.xlane.f32.xlu2 %v1406_v32 }
 0xda3   : > { %v1401_v33 = vmul.f32 %v1399_v11, %v2184_v16  ;;  %v1839_v11 = vld [vmem:[%s2452_s15 + $0x30] sm:$0xff] }
 0xda4   : > { %1610 = vmatpush.bf16.msra.mxu0 %v1839_v11 }
 0xda5   : > { %v1403_v34 = vsub.f32 %v2367_v28, %v1401_v33 }
 0xda7   : > { %v1405_v25 = vmul.f32 %v1403_v34, %v1403_v34 }
 0xda8   : > { %1611 = vmatpush.bf16.msra.mxu0 %v1838_v39 }
 0xda9   : > { %v1409_v35 = vsel %vm618_vm2, %v1405_v25, 0.0 }
 0xdaa   : > { %1410 = vadd.xlane.f32.xlu1 %v1409_v35 }
 0xe15   : > { %v1408_v36 = vpop.xlane.xlu2 %1407 }
 0xe16   : > { %v1412_v37 = vmul.f32 %v1408_v36, %v2184_v16 }
 0xe18   : > { %v1414_v38 = vadd.f32 1e-05, %v1412_v37 }
 0xe1a   : > { %1954 = vrsqrt.f32 %v1414_v38  ;;  %vm1422_vm4 = vweird.f32 %v1414_v38 }
 0xe1d   : > { %v1411_v40 = vpop.xlane.xlu1 %1410 }
 0xe1e   : > { %v1413_v41 = vmul.f32 %v1411_v40, %v2184_v16  ;;  %v1900_v16 = vld [vmem:[%s2448_s11 + $0x1] ss:$0 sm:$0xff] }
 0xe20   : > { %v1955_v42 = vpop.eup %1954  ;;  %v1415_v43 = vadd.f32 1e-05, %v1413_v41 }
 0xe21   : > { %v1417_v44 = vmul.f32 %v1955_v42, %v1414_v38  ;;  %vm1423_vm1 = vweird.f32 %v1955_v42 }
 0xe22   : > { %1956 = vrsqrt.f32 %v1415_v43  ;;  %vm1424_vm5 = vmor %vm1422_vm4, %vm1423_vm1  ;;  %vm1432_vm7 = vweird.f32 %v1415_v43 }
 0xe23   : > { %v1418_v45 = vmul.f32 %v1955_v42, %v1417_v44 }
 0xe25   : > { %v1419_v46 = vmul.f32 0.5, %v1418_v45  ;;  %v1837_v45 = vld [vmem:[%s2452_s15 + $0x20] sm:$0xff] }
 0xe26   : > { %1612 = vmatpush.bf16.msra.mxu0 %v1837_v45 }
 0xe27   : > { %v1420_v47 = vsub.f32 1.5, %v1419_v46 }
 0xe28   : > { %v1957_v48 = vpop.eup %1956 }
 0xe29   : > { %v1421_v49 = vmul.f32 %v1955_v42, %v1420_v47  ;;  %v1427_v50 = vmul.f32 %v1957_v48, %v1415_v43  ;;  %vm1433_vm6 = vweird.f32 %v1957_v48 }
 0xe2a   : > { %vm1434_vm8 = vmor %vm1432_vm7, %vm1433_vm6 }
 0xe2b   : > { %v1428_v51 = vmul.f32 %v1957_v48, %v1427_v50  ;;  %v1425_v52 = vsel %vm1424_vm5, %v1955_v42, %v1421_v49 }
 0xe2c   : > { %v1436_v58 = vmul.f32 %v1425_v52, %v1402_v31 }
 0xe2d   : > { %v1429_v53 = vmul.f32 0.5, %v1428_v51 }
 0xe2e   : > { %v1441_v57 = vmul.f32 %v1900_v16, %v1436_v58 }
 0xe2f   : > { %v1430_v56 = vsub.f32 1.5, %v1429_v53 }
 0xe30   : > { %v1446_v2 = vadd.f32 %v1901_v62, %v1441_v57 }
 0xe31   : > { %v1431_v59 = vmul.f32 %v1957_v48, %v1430_v56 }
 0xe33   : > { %v1435_v60 = vsel %vm1434_vm8, %v1957_v48, %v1431_v59 }
 0xe34   : > { %v1437_v63 = vmul.f32 %v1435_v60, %v1403_v34 }
 0xe36   : > { %v1442_v1 = vmul.f32 %v1900_v16, %v1437_v63 }
 0xe38   : > { %v1447_v3 = vadd.f32 %v1901_v62, %v1442_v1 }
 0xe3a   : > { %v1448_v4 = vpack.c.bf16 %v1447_v3, %v1446_v2 }
 0xe3c   : > { %1793 = vmatmul.msk.bf16.vlgmr.msrb.gmra.mxu2 %vm618_vm2, %v1448_v4 }
 0xebf   : > { %v1475_v10 = vpop.f32.mrf.mxu2 }
 0xec0   : > { %v2392_v12 = vadd.f32 %v1902_v9, %v1475_v10 }
 0xec2   : > { %v2395_v7 = vmul.f32 0.70710677, %v2392_v12 }
 0xec4   : > { %v1484_v13 = vmul.f32 %v2395_v7, %v2395_v7 }
 0xec6   : > { %v1485_v14 = vmin.f32 %v1484_v13, 16.0 }
 0xec7   : > { %v1477_v15 = vpop.f32.mrf.mxu2 }
 0xec8   : > { %v1486_v55 = vmul.f32 2.1237322e-06, %v1485_v14  ;;  %v1497_v5 = vmul.f32 3.8918573e-05, %v1485_v14  ;;  %v2399_v17 = vadd.f32 %v1902_v9, %v1477_v15 }
 0xeca   : > { %v1487_v18 = vadd.f32 0.00028619796, %v1486_v55  ;;  %v1498_v19 = vadd.f32 0.001143296, %v1497_v5  ;;  %v2402_v20 = vmul.f32 0.70710677, %v2399_v17 }
 0xecc   : > { %v1499_v8 = vmul.f32 %v1498_v19, %v1485_v14  ;;  %v1524_v0 = vmul.f32 %v2402_v20, %v2402_v20  ;;  %v1488_v21 = vmul.f32 %v1487_v18, %v1485_v14 }
 0xece   : > { %v1500_v22 = vadd.f32 0.014752088, %v1499_v8  ;;  %v1525_v54 = vmin.f32 %v1524_v0, 16.0  ;;  %v1489_v29 = vadd.f32 0.0036580483, %v1488_v21 }
 0xed0   : > { %v1501_v24 = vmul.f32 %v1500_v22, %v1485_v14  ;;  %v1526_v27 = vmul.f32 2.1237322e-06, %v1525_v54  ;;  %v1537_v6 = vmul.f32 3.8918573e-05, %v1525_v54  ;;  %v1490_v25 = vmul.f32 %v1489_v29, %v1485_v14 }
 0xed2   : > { %v1502_v30 = vadd.f32 0.112945676, %v1501_v24  ;;  %v1527_v31 = vadd.f32 0.00028619796, %v1526_v27  ;;  %v1538_v23 = vadd.f32 0.001143296, %v1537_v6 }
 0xed3   : > { %v1491_v41 = vadd.f32 0.05243302, %v1490_v25 }
 0xed4   : > { %v1503_v32 = vmul.f32 %v1502_v30, %v1485_v14  ;;  %v1528_v33 = vmul.f32 %v1527_v31, %v1525_v54  ;;  %v1539_v34 = vmul.f32 %v1538_v23, %v1525_v54  ;;  %v1480_v30 = vmul.f32 0.5, %v2392_v12 }
 0xed5   : > { %v1492_v47 = vmul.f32 %v1491_v41, %v1485_v14  ;;  %v1481_v31 = vmul.f32 0.5, %v2399_v17 }
 0xed6   : > { %v1504_v35 = vadd.f32 0.4994258, %v1503_v32  ;;  %v1529_v36 = vadd.f32 0.0036580483, %v1528_v33  ;;  %v1540_v37 = vadd.f32 0.014752088, %v1539_v34 }
 0xed7   : > { %v1493_v52 = vadd.f32 0.18741608, %v1492_v47 }
 0xed8   : > { %v1505_v38 = vmul.f32 %v1504_v35, %v1485_v14  ;;  %v1541_v40 = vmul.f32 %v1540_v37, %v1525_v54  ;;  %v1530_v43 = vmul.f32 %v1529_v36, %v1525_v54 }
 0xed9   : > { %v1494_v59 = vmul.f32 %v1493_v52, %v1485_v14 }
 0xeda   : > { %v1506_v42 = vadd.f32 1.0, %v1505_v38  ;;  %v1542_v44 = vadd.f32 0.112945676, %v1541_v40  ;;  %v1531_v48 = vadd.f32 0.05243302, %v1530_v43 }
 0xedb   : > { %v1495_v2 = vadd.f32 1.1283791, %v1494_v59 }
 0xedc   : > { %1958 = vrcp.f32 %v1506_v42  ;;  %v1543_v46 = vmul.f32 %v1542_v44, %v1525_v54  ;;  %v1532_v56 = vmul.f32 %v1531_v48, %v1525_v54  ;;  %v1518_v62 = vand.u32 2147483648, %v1506_v42 }
 0xedd   : > { %v1516_v63 = vand.u32 2147483647, %v1506_v42  ;;  %vm1512_vm11 = vweird.f32 %v1506_v42  ;;  %v1496_v55 = vmul.f32 %v1495_v2, %v2395_v7 }
 0xede   : > { %v1544_v49 = vadd.f32 0.4994258, %v1543_v46  ;;  %v1533_v57 = vadd.f32 0.18741608, %v1532_v56  ;;  %v1519_v9 = vor.u32 1.1754944e-38, %v1518_v62 }
 0xedf   : > { %vm1517_vm13 = vcmp.eq.f32.partialorder %v1516_v63, 8.507059e+37 }
 0xee0   : > { %v1545_v50 = vmul.f32 %v1544_v49, %v1525_v54  ;;  %v1534_v10 = vmul.f32 %v1533_v57, %v1525_v54 }
 0xee2   : > { %v1959_v51 = vpop.eup %1958  ;;  %v1546_v16 = vadd.f32 1.0, %v1545_v50  ;;  %v1535_v14 = vadd.f32 1.1283791, %v1534_v10 }
 0xee3   : > { %v1508_v53 = vmul.f32 %v1959_v51, %v1506_v42  ;;  %vm1513_vm9 = vweird.f32 %v1959_v51 }
 0xee4   : > { %1960 = vrcp.f32 %v1546_v16  ;;  %vm1514_vm12 = vmor %vm1512_vm11, %vm1513_vm9  ;;  %v1558_v18 = vand.u32 2147483648, %v1546_v16  ;;  %v1556_v0 = vand.u32 2147483647, %v1546_v16  ;;  %vm1552_vm15 = vweird.f32 %v1546_v16 }
 0xee5   : > { %v1509_v58 = vsub.f32 1.0, %v1508_v53  ;;  %v1536_v54 = vmul.f32 %v1535_v14, %v2402_v20  ;;  %v1903_v20 = vld [vmem:[%s2453_s16 + $0x1] ss:$0 sm:$0xff] }
 0xee6   : > { %v1559_v22 = vor.u32 1.1754944e-38, %v1558_v18  ;;  %vm1557_vm3 = vcmp.eq.f32.partialorder %v1556_v0, 8.507059e+37 }
 0xee7   : > { %v1510_v60 = vmul.f32 %v1959_v51, %v1509_v58 }
 0xee9   : > { %v1511_v1 = vadd.f32 %v1959_v51, %v1510_v60 }
 0xeea   : > { %v1961_v3 = vpop.eup %1960 }
 0xeeb   : > { %v1515_v4 = vsel %vm1514_vm12, %v1959_v51, %v1511_v1  ;;  %v1548_v13 = vmul.f32 %v1961_v3, %v1546_v16  ;;  %vm1553_vm14 = vweird.f32 %v1961_v3 }
 0xeec   : > { %v1520_v15 = vsel %vm1517_vm13, %v1519_v9, %v1515_v4  ;;  %vm1554_vm0 = vmor %vm1552_vm15, %vm1553_vm14 }
 0xeed   : > { %v1549_v5 = vsub.f32 1.0, %v1548_v13  ;;  %v1521_v19 = vmul.f32 %v1520_v15, %v1496_v55 }
 0xeef   : > { %v1550_v8 = vmul.f32 %v1961_v3, %v1549_v5  ;;  %v1794_v24 = vclamps-f32 %v1521_v19, 1.0 }
 0xef1   : > { %v1551_v21 = vadd.f32 %v1961_v3, %v1550_v8  ;;  %v1564_v7 = vadd.f32 1.0, %v1794_v24 }
 0xef3   : > { %v1555_v26 = vsel %vm1554_vm0, %v1961_v3, %v1551_v21  ;;  %v1566_v32 = vmul.f32 %v1564_v7, %v1480_v30 }
 0xef4   : > { %v1560_v27 = vsel %vm1557_vm3, %v1559_v22, %v1555_v26 }
 0xef5   : > { %v1561_v6 = vmul.f32 %v1560_v27, %v1536_v54 }
 0xef7   : > { %v1795_v29 = vclamps-f32 %v1561_v6, 1.0 }
 0xef9   : > { %v1565_v23 = vadd.f32 1.0, %v1795_v29 }
 0xefb   : > { %v1567_v11 = vmul.f32 %v1565_v23, %v1481_v31 }
 0xefd   : > { %v1568_v33 = vpack.c.bf16 %v1567_v11, %v1566_v32 }
 0xeff   : > { %1820 = vmatmul.msk.bf16.vlgmr.msra.gmra.mxu0 %vm1091_vm10, %v1568_v33 }
 0xf7c   : > { %v1614_v34 = vpop.f32.mrf.mxu0 }
 0xf7d   : > { %v1619_v25 = vadd.f32 %v1614_v34, %v2362_v61 }
 0xf7f   : > { %v1626_v12 = vadd.f32 %v1903_v20, %v1619_v25 }
 0xf81   : > { %1628 = vst.msk [vmem:[%s580_s23] sm:$0xff] %vm618_vm2, %v1626_v12 }
 0xf84   : > { %v1616_v17 = vpop.f32.mrf.mxu0 }
 0xf85   : > { %v1620_v35 = vadd.f32 %v1616_v17, %v2367_v28 }
 0xf87   : > { %v1627_v36 = vadd.f32 %v1903_v20, %v1620_v35 }
 0xf89   : > { %1629 = vst.msk [vmem:[%s580_s23 + $0x8] sm:$0xff] %vm618_vm2, %v1627_v36 }
 0xf8a PF: > { %s29_s22 = sadd.s32 1, %s2036_s22  }
 0xf8b   : > { %p26_p7 = scmp.ge.s32.totalorder %s29_s22, 4  }
 0xf8d   :  { %28 = sbr.rel (!%p26_p7) target bundleno = 5 (0x5), region = 139 }
 0xf92   :  { %1651 = vsyncpa [#allocation3], 1 }
 0xf93   :  { %1653 = vsyncpa [#allocation3 + $0x1], 1 }
 0xf94   :  { %1654 = vsyncpa [#allocation5], 1 }

</bundles_post_ra>
